<compile_context>
chip_gen: v7x
topology: tpu7x:2x2x1
jax: 0.10.0
libtpu: 0.0.40
codegen_flags: <defaults>
</compile_context>

<pallas_src>
import jax
import jax.numpy as jnp
from jax import lax
from jax.experimental import pallas as pl
from jax.experimental.pallas import tpu as pltpu


def _round_up(x, m):
    return (x + m - 1) // m * m


# -----------------------------------------------------------------------------
# Pallas kernel.  Grid = (2 weight sets, Tp/TT time blocks).
# The hidden state is carried across time-blocks in a VMEM scratch buffer and
# re-initialized from h0 whenever program_id(1) == 0 (start of each weight set).
# -----------------------------------------------------------------------------
def _gru_kernel(x_ref, h0_ref, w_ih_ref, w_hh_ref, b_gi_ref, bhn_ref,
                out_ref, gi_scr, h_scr):
    # x_ref  : (TT, Bp, I)    time-major input block (shared by both weight sets)
    # h0_ref : (Bp, Hp)       initial hidden state for this weight set
    # w_ih   : (I, 3Hp)       input->gates weights (pre-transposed, gate-padded)
    # w_hh   : (Hp, 3Hp)      hidden->gates weights (pre-transposed, padded)
    # b_gi   : (1, 3Hp)       b_ih + [b_hh_r, b_hh_z, 0]   (folded)
    # bhn    : (1, Hp)        b_hh_n (must stay inside the r-gated term)
    # out    : (TT, Bp, Hp)
    # gi_scr : (TT, Bp, 3Hp)  VMEM scratch for the fused input projection
    # h_scr  : (Bp, Hp)       carried hidden state
    t = pl.program_id(1)

    @pl.when(t == 0)
    def _():
        h_scr[...] = h0_ref[...]

    TT, Bp, Ip = x_ref.shape
    Hp = h_scr.shape[-1]

    # Fused input projection for the whole time block: one large-M MXU matmul
    # (amortizes MXU latency over TT*Bp rows) + the folded bias, written once
    # into VMEM scratch.  Gate g lives at a 128-aligned offset g*Hp.
    gi = jnp.dot(x_ref[...].reshape(TT * Bp, Ip), w_ih_ref[...],
                 preferred_element_type=jnp.float32)
    gi_scr[...] = (gi + b_gi_ref[...]).reshape(TT, Bp, 3 * Hp)

    w_hh = w_hh_ref[...]          # hoisted out of the serial loop
    b_hh_n = bhn_ref[...]

    def step(tt, h):
        gi_t = gi_scr[tt]                                       # (Bp, 3Hp)
        gh = jnp.dot(h, w_hh, preferred_element_type=jnp.float32)
        r = jax.nn.sigmoid(gi_t[:, :Hp] + gh[:, :Hp])
        z = jax.nn.sigmoid(gi_t[:, Hp:2 * Hp] + gh[:, Hp:2 * Hp])
        n = jnp.tanh(gi_t[:, 2 * Hp:] + r * (gh[:, 2 * Hp:] + b_hh_n))
        h_new = n + z * (h - n)                                 # == (1-z)*n + z*h
        out_ref[tt] = h_new.astype(out_ref.dtype)               # leading-dim store
        return h_new

    # Partial unroll: enough for LLO scheduling visibility without bloating
    # the instruction stream when TT is large.
    h_scr[...] = lax.fori_loop(0, TT, step, h_scr[...], unroll=min(8, TT))


# -----------------------------------------------------------------------------
# VMEM footprint model (double-buffered pipelined inputs/outputs + scratch),
# used both to auto-shrink the time block and to set vmem_limit_bytes.
# -----------------------------------------------------------------------------
_VMEM_BUDGET_BYTES = 40 << 20   # leaves headroom inside v7x's 64 MiB physical VMEM


def _kernel_vmem_bytes(TT, Bp, Ip, Hp):
    f32 = 4
    xb = 2 * TT * Bp * Ip * f32                 # x block, double-buffered
    outb = 2 * TT * Bp * Hp * f32               # output block, double-buffered
    gis = TT * Bp * 3 * Hp * f32                # gi scratch (single-buffered)
    wih = 2 * Ip * 3 * Hp * f32                 # W_ih (double-buffered)
    whh = 2 * Hp * 3 * Hp * f32                 # W_hh (double-buffered)
    misc = 2 * (3 * Hp + Hp + Bp * Hp) * f32 + Bp * Hp * f32
    return xb + outb + gis + wih + whh + misc


def fused_gru_pallas(xs, h0, w_ih, w_hh, b_gi, b_hh_n, *, time_block,
                     vmem_limit_bytes):
    """Fused ComplexGRU recurrence for both weight sets.

    xs     : (Tp, Bp, I)    time-major padded inputs (real rows | imag rows)
    h0     : (2, Bp, Hp)
    w_ih   : (2, I, 3Hp)
    w_hh   : (2, Hp, 3Hp)
    b_gi   : (2, 1, 3Hp)
    b_hh_n : (2, 1, Hp)
    Returns out : (2, Tp, Bp, Hp) float32 (time-major).
    """
    Tp, Bp, Ip = xs.shape
    S, _, Hp = h0.shape
    G = 3 * Hp
    TT = int(time_block)
    n_t = Tp // TT

    return pl.pallas_call(
        _gru_kernel,
        out_shape=jax.ShapeDtypeStruct((S, Tp, Bp, Hp), jnp.float32),
        grid_spec=pltpu.PrefetchScalarGridSpec(
            num_scalar_prefetch=0,
            grid=(S, n_t),
            in_specs=[
                pl.BlockSpec((TT, Bp, Ip), lambda s, t: (t, 0, 0)),      # x block
                pl.BlockSpec((None, Bp, Hp), lambda s, t: (s, 0, 0)),    # h0
                pl.BlockSpec((None, Ip, G), lambda s, t: (s, 0, 0)),     # W_ih^T
                pl.BlockSpec((None, Hp, G), lambda s, t: (s, 0, 0)),     # W_hh^T
                pl.BlockSpec((None, 1, G), lambda s, t: (s, 0, 0)),      # b_gi
                pl.BlockSpec((None, 1, Hp), lambda s, t: (s, 0, 0)),     # b_hh_n
            ],
            out_specs=pl.BlockSpec((None, TT, Bp, Hp), lambda s, t: (s, t, 0, 0)),
            scratch_shapes=[
                pltpu.VMEM((TT, Bp, G), jnp.float32),   # gi block scratch
                pltpu.VMEM((Bp, Hp), jnp.float32),      # carried hidden state
            ],
        ),
        compiler_params=pltpu.CompilerParams(
            # weight-set axis is independent (v7x megacore win; single-TC chips
            # simply iterate it); time axis is the sequential recurrence.
            dimension_semantics=("parallel", "arbitrary"),
            vmem_limit_bytes=int(vmem_limit_bytes),
        ),
    )(xs, h0, w_ih, w_hh, b_gi, b_hh_n)


# -----------------------------------------------------------------------------
# Parameter padding: place each gate's H columns at a 128-aligned offset g*Hp
# (zero pad lanes) so every gate slice inside the kernel is lane-aligned and
# padded hidden lanes provably stay 0 through the recurrence.
# -----------------------------------------------------------------------------
def _pad_gate_cols(w, H, Hp):
    parts = []
    for g in range(3):
        wg = w[..., g * H:(g + 1) * H]
        wg = jnp.pad(wg, [(0, 0)] * (w.ndim - 1) + [(0, Hp - H)])
        parts.append(wg)
    return jnp.concatenate(parts, axis=-1)


def _prep_params(params, Hp):
    H = params["w_hh_t"].shape[0]
    w_ih_p = _pad_gate_cols(params["w_ih_t"], H, Hp)          # (I, 3Hp)
    w_hh_p = _pad_gate_cols(params["w_hh_t"], H, Hp)
    w_hh_p = jnp.pad(w_hh_p, ((0, Hp - H), (0, 0)))           # (Hp, 3Hp)
    b_ih_p = _pad_gate_cols(params["b_ih"], H, Hp)            # (3Hp,)
    b_hh_p = _pad_gate_cols(params["b_hh"], H, Hp)            # (3Hp,)
    # Fold the r/z hidden biases into the hoisted input-side bias; only the
    # n-gate hidden bias must stay inside the recurrence (it is gated by r).
    b_gi = (b_ih_p + b_hh_p.at[2 * Hp:].set(0.0))[None, :]    # (1, 3Hp)
    b_hh_n = b_hh_p[2 * Hp:][None, :]                         # (1, Hp)
    return w_ih_p, w_hh_p, b_gi, b_hh_n


# -----------------------------------------------------------------------------
# ComplexGRU forward (num_layers=1, unidirectional, batch_first=True).
# -----------------------------------------------------------------------------
def complex_gru_forward(x, params_r, params_i,
                        h_rr=None, h_ir=None, h_ri=None, h_ii=None,
                        *, time_block=64):
    """x: complex64 (B, T, I). Returns (y complex64 (B,T,H), h_rr, h_ir, h_ri, h_ii)."""
    B, T, I = x.shape
    H = params_r["w_hh_t"].shape[0]
    Hp = _round_up(H, 128)
    Bp = _round_up(2 * B, 8)

    # Pick the largest time block that fits the VMEM budget (v7x-safe), kept a
    # multiple of 8 and no larger than the (rounded) sequence length.
    TT = max(8, min(_round_up(int(time_block), 8), _round_up(T, 8)))
    while TT > 8 and _kernel_vmem_bytes(TT, Bp, I, Hp) > _VMEM_BUDGET_BYTES:
        TT = max(8, (TT // 2) // 8 * 8)
    Tp = _round_up(T, TT)
    need = _kernel_vmem_bytes(TT, Bp, I, Hp)
    vmem_limit = int(min(max(1.5 * need + (4 << 20), 16 << 20), 64 << 20))

    x_real = jnp.real(x).astype(jnp.float32)
    x_imag = jnp.imag(x).astype(jnp.float32)
    # Stack real/imag along batch (rows [0:B] = x.real, [B:2B] = x.imag), then
    # a single cheap relayout of the small x tensor to time-major for the kernel.
    xs = jnp.concatenate([x_real, x_imag], axis=0)               # (2B, T, I)
    xs = jnp.transpose(xs, (1, 0, 2))                            # (T, 2B, I)
    xs = jnp.pad(xs, ((0, Tp - T), (0, Bp - 2 * B), (0, 0)))     # (Tp, Bp, I)

    w_ih_r, w_hh_r, bgi_r, bhn_r = _prep_params(params_r, Hp)
    w_ih_i, w_hh_i, bgi_i, bhn_i = _prep_params(params_i, Hp)
    w_ih = jnp.stack([w_ih_r, w_ih_i])                           # (2, I, 3Hp)
    w_hh = jnp.stack([w_hh_r, w_hh_i])                           # (2, Hp, 3Hp)
    b_gi = jnp.stack([bgi_r, bgi_i])                             # (2, 1, 3Hp)
    b_hh_n = jnp.stack([bhn_r, bhn_i])                           # (2, 1, Hp)

    # Stacked / padded initial hidden states: s=0 -> gru_r, s=1 -> gru_i.
    def h0_block(h_a, h_b):
        ha = jnp.zeros((B, H), jnp.float32) if h_a is None else h_a[0].astype(jnp.float32)
        hb = jnp.zeros((B, H), jnp.float32) if h_b is None else h_b[0].astype(jnp.float32)
        h = jnp.concatenate([ha, hb], axis=0)                    # (2B, H)
        return jnp.pad(h, ((0, Bp - 2 * B), (0, Hp - H)))

    h0 = jnp.stack([h0_block(h_rr, h_ir), h0_block(h_ri, h_ii)])  # (2, Bp, Hp)

    out = fused_gru_pallas(xs, h0, w_ih, w_hh, b_gi, b_hh_n,
                           time_block=TT, vmem_limit_bytes=vmem_limit)

    # Strip padding (time-major), take final hidden states before any relayout.
    out = out[:, :T, :2 * B, :H]                                  # (2, T, 2B, H)
    Frr, Fir = out[0, :, :B], out[0, :, B:]                       # (T, B, H)
    Fri, Fii = out[1, :, :B], out[1, :, B:]
    h_rr_o = Frr[-1][None]
    h_ir_o = Fir[-1][None]
    h_ri_o = Fri[-1][None]
    h_ii_o = Fii[-1][None]

    # Complex combine in time-major, then one batch-first relayout of only the
    # final complex y (half the bytes of relayouting the padded f32 kernel out).
    y = jnp.transpose(jax.lax.complex(Frr - Fii, Fri + Fir), (1, 0, 2))  # (B,T,H)
    return y, h_rr_o, h_ir_o, h_ri_o, h_ii_o


# -----------------------------------------------------------------------------
# Deterministic parameter init (mimics nn.GRU: uniform(-1/sqrt(H), 1/sqrt(H))).
# -----------------------------------------------------------------------------
def init_gru_params(key, input_size, hidden_size, dtype=jnp.float32):
    k = 1.0 / jnp.sqrt(hidden_size)
    k1, k2, k3, k4 = jax.random.split(key, 4)
    w_ih = jax.random.uniform(k1, (3 * hidden_size, input_size), dtype, -k, k)
    w_hh = jax.random.uniform(k2, (3 * hidden_size, hidden_size), dtype, -k, k)
    b_ih = jax.random.uniform(k3, (3 * hidden_size,), dtype, -k, k)
    b_hh = jax.random.uniform(k4, (3 * hidden_size,), dtype, -k, k)
    return {
        "w_ih_t": w_ih.T,          # (I, 3H), gate order (r, z, n)
        "w_hh_t": w_hh.T,          # (H, 3H)
        "b_ih": b_ih,              # (3H,)
        "b_hh": b_hh,              # (3H,)
    }


# -----------------------------------------------------------------------------
# Pure-JAX reference GRU (lax.scan) for correctness checking.
# -----------------------------------------------------------------------------
def gru_ref(x_btI, params, h0_bh):
    H = params["w_hh_t"].shape[0]

    def step(h, x_t):
        gi = x_t @ params["w_ih_t"] + params["b_ih"]
        gh = h @ params["w_hh_t"] + params["b_hh"]
        i_r, i_z, i_n = gi[:, :H], gi[:, H:2 * H], gi[:, 2 * H:]
        h_r, h_z, h_n = gh[:, :H], gh[:, H:2 * H], gh[:, 2 * H:]
        r = jax.nn.sigmoid(i_r + h_r)
        z = jax.nn.sigmoid(i_z + h_z)
        n = jnp.tanh(i_n + r * h_n)
        h_new = (1.0 - z) * n + z * h
        return h_new, h_new

    x_tbi = jnp.transpose(x_btI, (1, 0, 2))
    h_last, out = lax.scan(step, h0_bh, x_tbi)
    return jnp.transpose(out, (1, 0, 2)), h_last[None]


if __name__ == "__main__":
    B, T, I, H = 2, 8, 16, 32

    key = jax.random.PRNGKey(0)
    kxr, kxi, kpr, kpi = jax.random.split(key, 4)
    x_real = jax.random.normal(kxr, (B, T, I), jnp.float32)
    x_imag = jax.random.normal(kxi, (B, T, I), jnp.float32)
    x = jax.lax.complex(x_real, x_imag)      # (B, T, I) complex64, batch_first

    params_r = init_gru_params(kpr, I, H)
    params_i = init_gru_params(kpi, I, H)

    fwd = jax.jit(complex_gru_forward)
    y, h_rr, h_ir, h_ri, h_ii = fwd(x, params_r, params_i)
    jax.block_until_ready((y, h_rr, h_ir, h_ri, h_ii))

    # Cross-check against a pure-JAX scan reference.
    zeros = jnp.zeros((B, H), jnp.float32)
    Frr_ref, hrr_ref = gru_ref(x_real, params_r, zeros)
    Fir_ref, hir_ref = gru_ref(x_imag, params_r, zeros)
    Fri_ref, hri_ref = gru_ref(x_real, params_i, zeros)
    Fii_ref, hii_ref = gru_ref(x_imag, params_i, zeros)
    y_ref = jax.lax.complex(Frr_ref - Fii_ref, Fri_ref + Fir_ref)

    assert y.shape == (B, T, H) and y.dtype == jnp.complex64
    assert h_rr.shape == (1, B, H)
    assert jnp.allclose(y, y_ref, atol=1e-5, rtol=1e-5)
    assert jnp.allclose(h_rr, hrr_ref, atol=1e-5, rtol=1e-5)
    assert jnp.allclose(h_ir, hir_ref, atol=1e-5, rtol=1e-5)
    assert jnp.allclose(h_ri, hri_ref, atol=1e-5, rtol=1e-5)
    assert jnp.allclose(h_ii, hii_ref, atol=1e-5, rtol=1e-5)

    print("KERNEL_OK")
</pallas_src>

<mosaic_0001>
module attributes {stable_mosaic.version = 11 : i64} {
  func.func @_gru_kernel(%arg0: i32, %arg1: i32, %arg2: memref<8x8x16xf32, #tpu.memory_space<vmem>>, %arg3: memref<1x8x128xf32, #tpu.memory_space<vmem>>, %arg4: memref<1x16x384xf32, #tpu.memory_space<vmem>>, %arg5: memref<1x128x384xf32, #tpu.memory_space<vmem>>, %arg6: memref<1x1x384xf32, #tpu.memory_space<vmem>>, %arg7: memref<1x1x128xf32, #tpu.memory_space<vmem>>, %arg8: memref<1x8x8x128xf32, #tpu.memory_space<vmem>>, %arg9: memref<8x8x384xf32, #tpu.memory_space<vmem>>, %arg10: memref<8x128xf32, #tpu.memory_space<vmem>>) attributes {dimension_semantics = [#tpu.dimension_semantics<parallel>, #tpu.dimension_semantics<arbitrary>], iteration_bounds = array<i64: 2, 1>, scalar_prefetch = 0 : i64, scratch_operands = 2 : i64, tpu.core_type = #tpu.core_type<tc>, window_params = [{transform_indices = @transform_0, window_bounds = array<i64: 8, 8, 16>}, {transform_indices = @transform_1, window_bounds = array<i64: 1, 8, 128>}, {transform_indices = @transform_2, window_bounds = array<i64: 1, 16, 384>}, {transform_indices = @transform_3, window_bounds = array<i64: 1, 128, 384>}, {transform_indices = @transform_4, window_bounds = array<i64: 1, 1, 384>}, {transform_indices = @transform_5, window_bounds = array<i64: 1, 1, 128>}, {transform_indices = @transform_6, window_bounds = array<i64: 1, 8, 8, 128>}]} {
    %c0_i32 = arith.constant 0 : i32
    %0 = arith.cmpi eq, %arg1, %c0_i32 : i32
    %1 = arith.extui %0 : i1 to i32
    %c0_i32_0 = arith.constant 0 : i32
    %2 = arith.cmpi ne, %1, %c0_i32_0 : i32
    scf.if %2 {
      %c0_87 = arith.constant 0 : index
      %c0_88 = arith.constant 0 : index
      %c0_89 = arith.constant 0 : index
      %292 = vector.load %arg3[%c0_87, %c0_88, %c0_89] : memref<1x8x128xf32, #tpu.memory_space<vmem>>, vector<1x8x128xf32>
      %293 = vector.shape_cast %292 : vector<1x8x128xf32> to vector<8x128xf32>
      %c0_90 = arith.constant 0 : index
      %c0_91 = arith.constant 0 : index
      %294 = vector.load %arg10[%c0_90, %c0_91] : memref<8x128xf32, #tpu.memory_space<vmem>>, vector<8x128xf32>
      tpu.vector_store %arg10[%c0_90, %c0_91], %293 {strides = array<i32>} : memref<8x128xf32, #tpu.memory_space<vmem>>, vector<8x128xf32>,
    } else {
    }
    %c0 = arith.constant 0 : index
    %c0_1 = arith.constant 0 : index
    %c0_2 = arith.constant 0 : index
    %3 = vector.load %arg2[%c0, %c0_1, %c0_2] : memref<8x8x16xf32, #tpu.memory_space<vmem>>, vector<8x8x16xf32>
    %4 = vector.shape_cast %3 : vector<8x8x16xf32> to vector<64x16xf32>
    %c0_3 = arith.constant 0 : index
    %c0_4 = arith.constant 0 : index
    %c0_5 = arith.constant 0 : index
    %5 = vector.load %arg4[%c0_3, %c0_4, %c0_5] : memref<1x16x384xf32, #tpu.memory_space<vmem>>, vector<1x16x384xf32>
    %6 = vector.shape_cast %5 : vector<1x16x384xf32> to vector<16x384xf32>
    %cst = arith.constant dense<0.000000e+00> : vector<64x384xf32>
    %7 = tpu.matmul %4, %6, %cst {dimension_numbers = #tpu.dot_dimension_numbers<[1], [0], [0], [1], [0, 0, 1, 1], [], []>} : vector<64x16xf32>, vector<16x384xf32>, vector<64x384xf32> -> vector<64x384xf32>
    %c0_6 = arith.constant 0 : index
    %c0_7 = arith.constant 0 : index
    %c0_8 = arith.constant 0 : index
    %8 = vector.load %arg6[%c0_6, %c0_7, %c0_8] : memref<1x1x384xf32, #tpu.memory_space<vmem>>, vector<1x1x384xf32>
    %9 = vector.shape_cast %8 : vector<1x1x384xf32> to vector<1x384xf32>
    %10 = vector.broadcast %9 : vector<1x384xf32> to vector<64x384xf32>
    %11 = arith.addf %7, %10 : vector<64x384xf32>
    %12 = vector.shape_cast %11 : vector<64x384xf32> to vector<8x8x384xf32>
    %c0_9 = arith.constant 0 : index
    %c0_10 = arith.constant 0 : index
    %c0_11 = arith.constant 0 : index
    %13 = vector.load %arg9[%c0_9, %c0_10, %c0_11] : memref<8x8x384xf32, #tpu.memory_space<vmem>>, vector<8x8x384xf32>
    tpu.vector_store %arg9[%c0_9, %c0_10, %c0_11], %12 {strides = array<i32>} : memref<8x8x384xf32, #tpu.memory_space<vmem>>, vector<8x8x384xf32>,
    %c0_12 = arith.constant 0 : index
    %c0_13 = arith.constant 0 : index
    %c0_14 = arith.constant 0 : index
    %14 = vector.load %arg5[%c0_12, %c0_13, %c0_14] : memref<1x128x384xf32, #tpu.memory_space<vmem>>, vector<1x128x384xf32>
    %15 = vector.shape_cast %14 : vector<1x128x384xf32> to vector<128x384xf32>
    %c0_15 = arith.constant 0 : index
    %c0_16 = arith.constant 0 : index
    %c0_17 = arith.constant 0 : index
    %16 = vector.load %arg7[%c0_15, %c0_16, %c0_17] : memref<1x1x128xf32, #tpu.memory_space<vmem>>, vector<1x1x128xf32>
    %17 = vector.shape_cast %16 : vector<1x1x128xf32> to vector<1x128xf32>
    %c0_18 = arith.constant 0 : index
    %c0_19 = arith.constant 0 : index
    %18 = vector.load %arg10[%c0_18, %c0_19] : memref<8x128xf32, #tpu.memory_space<vmem>>, vector<8x128xf32>
    %c0_i32_20 = arith.constant 0 : i32
    %19 = arith.index_cast %c0_i32_20 : i32 to index
    %c0_21 = arith.constant 0 : index
    %c0_22 = arith.constant 0 : index
    %20 = vector.load %arg9[%19, %c0_21, %c0_22] : memref<8x8x384xf32, #tpu.memory_space<vmem>>, vector<1x8x384xf32>
    %21 = vector.shape_cast %20 : vector<1x8x384xf32> to vector<8x384xf32>
    %cst_23 = arith.constant dense<0.000000e+00> : vector<8x384xf32>
    %22 = tpu.matmul %18, %15, %cst_23 {dimension_numbers = #tpu.dot_dimension_numbers<[1], [0], [0], [1], [0, 0, 1, 1], [], []>} : vector<8x128xf32>, vector<128x384xf32>, vector<8x384xf32> -> vector<8x384xf32>
    %23 = vector.extract_strided_slice %21 {offsets = [0, 0], sizes = [8, 128], strides = [1, 1]} : vector<8x384xf32> to vector<8x128xf32>
    %24 = vector.extract_strided_slice %22 {offsets = [0, 0], sizes = [8, 128], strides = [1, 1]} : vector<8x384xf32> to vector<8x128xf32>
    %25 = arith.addf %23, %24 : vector<8x128xf32>
    %26 = arith.negf %25 : vector<8x128xf32>
    %27 = math.exp %26 : vector<8x128xf32>
    %cst_24 = arith.constant 1.000000e+00 : f32
    %28 = vector.broadcast %cst_24 : f32 to vector<8x128xf32>
    %29 = arith.addf %28, %27 : vector<8x128xf32>
    %30 = arith.divf %28, %29 : vector<8x128xf32>
    %31 = vector.extract_strided_slice %21 {offsets = [0, 128], sizes = [8, 128], strides = [1, 1]} : vector<8x384xf32> to vector<8x128xf32>
    %32 = vector.extract_strided_slice %22 {offsets = [0, 128], sizes = [8, 128], strides = [1, 1]} : vector<8x384xf32> to vector<8x128xf32>
    %33 = arith.addf %31, %32 : vector<8x128xf32>
    %34 = arith.negf %33 : vector<8x128xf32>
    %35 = math.exp %34 : vector<8x128xf32>
    %cst_25 = arith.constant 1.000000e+00 : f32
    %36 = vector.broadcast %cst_25 : f32 to vector<8x128xf32>
    %37 = arith.addf %36, %35 : vector<8x128xf32>
    %38 = arith.divf %36, %37 : vector<8x128xf32>
    %39 = vector.extract_strided_slice %21 {offsets = [0, 256], sizes = [8, 128], strides = [1, 1]} : vector<8x384xf32> to vector<8x128xf32>
    %40 = vector.extract_strided_slice %22 {offsets = [0, 256], sizes = [8, 128], strides = [1, 1]} : vector<8x384xf32> to vector<8x128xf32>
    %41 = vector.broadcast %17 : vector<1x128xf32> to vector<8x128xf32>
    %42 = arith.addf %40, %41 : vector<8x128xf32>
    %43 = arith.mulf %30, %42 : vector<8x128xf32>
    %44 = arith.addf %39, %43 : vector<8x128xf32>
    %45 = math.tanh %44 : vector<8x128xf32>
    %46 = arith.subf %18, %45 : vector<8x128xf32>
    %47 = arith.mulf %38, %46 : vector<8x128xf32>
    %48 = arith.addf %45, %47 : vector<8x128xf32>
    %c0_26 = arith.constant 0 : index
    %49 = arith.index_cast %c0_i32_20 : i32 to index
    %c0_27 = arith.constant 0 : index
    %c0_28 = arith.constant 0 : index
    %50 = vector.load %arg8[%c0_26, %49, %c0_27, %c0_28] : memref<1x8x8x128xf32, #tpu.memory_space<vmem>>, vector<1x1x8x128xf32>
    %51 = vector.shape_cast %50 : vector<1x1x8x128xf32> to vector<8x128xf32>
    %52 = vector.shape_cast %48 : vector<8x128xf32> to vector<1x1x8x128xf32>
    tpu.vector_store %arg8[%c0_26, %49, %c0_27, %c0_28], %52 {strides = array<i32>} : memref<1x8x8x128xf32, #tpu.memory_space<vmem>>, vector<1x1x8x128xf32>,
    %c1_i32 = arith.constant 1 : i32
    %53 = arith.index_cast %c1_i32 : i32 to index
    %c0_29 = arith.constant 0 : index
    %c0_30 = arith.constant 0 : index
    %54 = vector.load %arg9[%53, %c0_29, %c0_30] : memref<8x8x384xf32, #tpu.memory_space<vmem>>, vector<1x8x384xf32>
    %55 = vector.shape_cast %54 : vector<1x8x384xf32> to vector<8x384xf32>
    %cst_31 = arith.constant dense<0.000000e+00> : vector<8x384xf32>
    %56 = tpu.matmul %48, %15, %cst_31 {dimension_numbers = #tpu.dot_dimension_numbers<[1], [0], [0], [1], [0, 0, 1, 1], [], []>} : vector<8x128xf32>, vector<128x384xf32>, vector<8x384xf32> -> vector<8x384xf32>
    %57 = vector.extract_strided_slice %55 {offsets = [0, 0], sizes = [8, 128], strides = [1, 1]} : vector<8x384xf32> to vector<8x128xf32>
    %58 = vector.extract_strided_slice %56 {offsets = [0, 0], sizes = [8, 128], strides = [1, 1]} : vector<8x384xf32> to vector<8x128xf32>
    %59 = arith.addf %57, %58 : vector<8x128xf32>
    %60 = arith.negf %59 : vector<8x128xf32>
    %61 = math.exp %60 : vector<8x128xf32>
    %cst_32 = arith.constant 1.000000e+00 : f32
    %62 = vector.broadcast %cst_32 : f32 to vector<8x128xf32>
    %63 = arith.addf %62, %61 : vector<8x128xf32>
    %64 = arith.divf %62, %63 : vector<8x128xf32>
    %65 = vector.extract_strided_slice %55 {offsets = [0, 128], sizes = [8, 128], strides = [1, 1]} : vector<8x384xf32> to vector<8x128xf32>
    %66 = vector.extract_strided_slice %56 {offsets = [0, 128], sizes = [8, 128], strides = [1, 1]} : vector<8x384xf32> to vector<8x128xf32>
    %67 = arith.addf %65, %66 : vector<8x128xf32>
    %68 = arith.negf %67 : vector<8x128xf32>
    %69 = math.exp %68 : vector<8x128xf32>
    %cst_33 = arith.constant 1.000000e+00 : f32
    %70 = vector.broadcast %cst_33 : f32 to vector<8x128xf32>
    %71 = arith.addf %70, %69 : vector<8x128xf32>
    %72 = arith.divf %70, %71 : vector<8x128xf32>
    %73 = vector.extract_strided_slice %55 {offsets = [0, 256], sizes = [8, 128], strides = [1, 1]} : vector<8x384xf32> to vector<8x128xf32>
    %74 = vector.extract_strided_slice %56 {offsets = [0, 256], sizes = [8, 128], strides = [1, 1]} : vector<8x384xf32> to vector<8x128xf32>
    %75 = vector.broadcast %17 : vector<1x128xf32> to vector<8x128xf32>
    %76 = arith.addf %74, %75 : vector<8x128xf32>
    %77 = arith.mulf %64, %76 : vector<8x128xf32>
    %78 = arith.addf %73, %77 : vector<8x128xf32>
    %79 = math.tanh %78 : vector<8x128xf32>
    %80 = arith.subf %48, %79 : vector<8x128xf32>
    %81 = arith.mulf %72, %80 : vector<8x128xf32>
    %82 = arith.addf %79, %81 : vector<8x128xf32>
    %c0_34 = arith.constant 0 : index
    %83 = arith.index_cast %c1_i32 : i32 to index
    %c0_35 = arith.constant 0 : index
    %c0_36 = arith.constant 0 : index
    %84 = vector.load %arg8[%c0_34, %83, %c0_35, %c0_36] : memref<1x8x8x128xf32, #tpu.memory_space<vmem>>, vector<1x1x8x128xf32>
    %85 = vector.shape_cast %84 : vector<1x1x8x128xf32> to vector<8x128xf32>
    %86 = vector.shape_cast %82 : vector<8x128xf32> to vector<1x1x8x128xf32>
    tpu.vector_store %arg8[%c0_34, %83, %c0_35, %c0_36], %86 {strides = array<i32>} : memref<1x8x8x128xf32, #tpu.memory_space<vmem>>, vector<1x1x8x128xf32>,
    %c2_i32 = arith.constant 2 : i32
    %87 = arith.index_cast %c2_i32 : i32 to index
    %c0_37 = arith.constant 0 : index
    %c0_38 = arith.constant 0 : index
    %88 = vector.load %arg9[%87, %c0_37, %c0_38] : memref<8x8x384xf32, #tpu.memory_space<vmem>>, vector<1x8x384xf32>
    %89 = vector.shape_cast %88 : vector<1x8x384xf32> to vector<8x384xf32>
    %cst_39 = arith.constant dense<0.000000e+00> : vector<8x384xf32>
    %90 = tpu.matmul %82, %15, %cst_39 {dimension_numbers = #tpu.dot_dimension_numbers<[1], [0], [0], [1], [0, 0, 1, 1], [], []>} : vector<8x128xf32>, vector<128x384xf32>, vector<8x384xf32> -> vector<8x384xf32>
    %91 = vector.extract_strided_slice %89 {offsets = [0, 0], sizes = [8, 128], strides = [1, 1]} : vector<8x384xf32> to vector<8x128xf32>
    %92 = vector.extract_strided_slice %90 {offsets = [0, 0], sizes = [8, 128], strides = [1, 1]} : vector<8x384xf32> to vector<8x128xf32>
    %93 = arith.addf %91, %92 : vector<8x128xf32>
    %94 = arith.negf %93 : vector<8x128xf32>
    %95 = math.exp %94 : vector<8x128xf32>
    %cst_40 = arith.constant 1.000000e+00 : f32
    %96 = vector.broadcast %cst_40 : f32 to vector<8x128xf32>
    %97 = arith.addf %96, %95 : vector<8x128xf32>
    %98 = arith.divf %96, %97 : vector<8x128xf32>
    %99 = vector.extract_strided_slice %89 {offsets = [0, 128], sizes = [8, 128], strides = [1, 1]} : vector<8x384xf32> to vector<8x128xf32>
    %100 = vector.extract_strided_slice %90 {offsets = [0, 128], sizes = [8, 128], strides = [1, 1]} : vector<8x384xf32> to vector<8x128xf32>
    %101 = arith.addf %99, %100 : vector<8x128xf32>
    %102 = arith.negf %101 : vector<8x128xf32>
    %103 = math.exp %102 : vector<8x128xf32>
    %cst_41 = arith.constant 1.000000e+00 : f32
    %104 = vector.broadcast %cst_41 : f32 to vector<8x128xf32>
    %105 = arith.addf %104, %103 : vector<8x128xf32>
    %106 = arith.divf %104, %105 : vector<8x128xf32>
    %107 = vector.extract_strided_slice %89 {offsets = [0, 256], sizes = [8, 128], strides = [1, 1]} : vector<8x384xf32> to vector<8x128xf32>
    %108 = vector.extract_strided_slice %90 {offsets = [0, 256], sizes = [8, 128], strides = [1, 1]} : vector<8x384xf32> to vector<8x128xf32>
    %109 = vector.broadcast %17 : vector<1x128xf32> to vector<8x128xf32>
    %110 = arith.addf %108, %109 : vector<8x128xf32>
    %111 = arith.mulf %98, %110 : vector<8x128xf32>
    %112 = arith.addf %107, %111 : vector<8x128xf32>
    %113 = math.tanh %112 : vector<8x128xf32>
    %114 = arith.subf %82, %113 : vector<8x128xf32>
    %115 = arith.mulf %106, %114 : vector<8x128xf32>
    %116 = arith.addf %113, %115 : vector<8x128xf32>
    %c0_42 = arith.constant 0 : index
    %117 = arith.index_cast %c2_i32 : i32 to index
    %c0_43 = arith.constant 0 : index
    %c0_44 = arith.constant 0 : index
    %118 = vector.load %arg8[%c0_42, %117, %c0_43, %c0_44] : memref<1x8x8x128xf32, #tpu.memory_space<vmem>>, vector<1x1x8x128xf32>
    %119 = vector.shape_cast %118 : vector<1x1x8x128xf32> to vector<8x128xf32>
    %120 = vector.shape_cast %116 : vector<8x128xf32> to vector<1x1x8x128xf32>
    tpu.vector_store %arg8[%c0_42, %117, %c0_43, %c0_44], %120 {strides = array<i32>} : memref<1x8x8x128xf32, #tpu.memory_space<vmem>>, vector<1x1x8x128xf32>,
    %c3_i32 = arith.constant 3 : i32
    %121 = arith.index_cast %c3_i32 : i32 to index
    %c0_45 = arith.constant 0 : index
    %c0_46 = arith.constant 0 : index
    %122 = vector.load %arg9[%121, %c0_45, %c0_46] : memref<8x8x384xf32, #tpu.memory_space<vmem>>, vector<1x8x384xf32>
    %123 = vector.shape_cast %122 : vector<1x8x384xf32> to vector<8x384xf32>
    %cst_47 = arith.constant dense<0.000000e+00> : vector<8x384xf32>
    %124 = tpu.matmul %116, %15, %cst_47 {dimension_numbers = #tpu.dot_dimension_numbers<[1], [0], [0], [1], [0, 0, 1, 1], [], []>} : vector<8x128xf32>, vector<128x384xf32>, vector<8x384xf32> -> vector<8x384xf32>
    %125 = vector.extract_strided_slice %123 {offsets = [0, 0], sizes = [8, 128], strides = [1, 1]} : vector<8x384xf32> to vector<8x128xf32>
    %126 = vector.extract_strided_slice %124 {offsets = [0, 0], sizes = [8, 128], strides = [1, 1]} : vector<8x384xf32> to vector<8x128xf32>
    %127 = arith.addf %125, %126 : vector<8x128xf32>
    %128 = arith.negf %127 : vector<8x128xf32>
    %129 = math.exp %128 : vector<8x128xf32>
    %cst_48 = arith.constant 1.000000e+00 : f32
    %130 = vector.broadcast %cst_48 : f32 to vector<8x128xf32>
    %131 = arith.addf %130, %129 : vector<8x128xf32>
    %132 = arith.divf %130, %131 : vector<8x128xf32>
    %133 = vector.extract_strided_slice %123 {offsets = [0, 128], sizes = [8, 128], strides = [1, 1]} : vector<8x384xf32> to vector<8x128xf32>
    %134 = vector.extract_strided_slice %124 {offsets = [0, 128], sizes = [8, 128], strides = [1, 1]} : vector<8x384xf32> to vector<8x128xf32>
    %135 = arith.addf %133, %134 : vector<8x128xf32>
    %136 = arith.negf %135 : vector<8x128xf32>
    %137 = math.exp %136 : vector<8x128xf32>
    %cst_49 = arith.constant 1.000000e+00 : f32
    %138 = vector.broadcast %cst_49 : f32 to vector<8x128xf32>
    %139 = arith.addf %138, %137 : vector<8x128xf32>
    %140 = arith.divf %138, %139 : vector<8x128xf32>
    %141 = vector.extract_strided_slice %123 {offsets = [0, 256], sizes = [8, 128], strides = [1, 1]} : vector<8x384xf32> to vector<8x128xf32>
    %142 = vector.extract_strided_slice %124 {offsets = [0, 256], sizes = [8, 128], strides = [1, 1]} : vector<8x384xf32> to vector<8x128xf32>
    %143 = vector.broadcast %17 : vector<1x128xf32> to vector<8x128xf32>
    %144 = arith.addf %142, %143 : vector<8x128xf32>
    %145 = arith.mulf %132, %144 : vector<8x128xf32>
    %146 = arith.addf %141, %145 : vector<8x128xf32>
    %147 = math.tanh %146 : vector<8x128xf32>
    %148 = arith.subf %116, %147 : vector<8x128xf32>
    %149 = arith.mulf %140, %148 : vector<8x128xf32>
    %150 = arith.addf %147, %149 : vector<8x128xf32>
    %c0_50 = arith.constant 0 : index
    %151 = arith.index_cast %c3_i32 : i32 to index
    %c0_51 = arith.constant 0 : index
    %c0_52 = arith.constant 0 : index
    %152 = vector.load %arg8[%c0_50, %151, %c0_51, %c0_52] : memref<1x8x8x128xf32, #tpu.memory_space<vmem>>, vector<1x1x8x128xf32>
    %153 = vector.shape_cast %152 : vector<1x1x8x128xf32> to vector<8x128xf32>
    %154 = vector.shape_cast %150 : vector<8x128xf32> to vector<1x1x8x128xf32>
    tpu.vector_store %arg8[%c0_50, %151, %c0_51, %c0_52], %154 {strides = array<i32>} : memref<1x8x8x128xf32, #tpu.memory_space<vmem>>, vector<1x1x8x128xf32>,
    %c4_i32 = arith.constant 4 : i32
    %155 = arith.index_cast %c4_i32 : i32 to index
    %c0_53 = arith.constant 0 : index
    %c0_54 = arith.constant 0 : index
    %156 = vector.load %arg9[%155, %c0_53, %c0_54] : memref<8x8x384xf32, #tpu.memory_space<vmem>>, vector<1x8x384xf32>
    %157 = vector.shape_cast %156 : vector<1x8x384xf32> to vector<8x384xf32>
    %cst_55 = arith.constant dense<0.000000e+00> : vector<8x384xf32>
    %158 = tpu.matmul %150, %15, %cst_55 {dimension_numbers = #tpu.dot_dimension_numbers<[1], [0], [0], [1], [0, 0, 1, 1], [], []>} : vector<8x128xf32>, vector<128x384xf32>, vector<8x384xf32> -> vector<8x384xf32>
    %159 = vector.extract_strided_slice %157 {offsets = [0, 0], sizes = [8, 128], strides = [1, 1]} : vector<8x384xf32> to vector<8x128xf32>
    %160 = vector.extract_strided_slice %158 {offsets = [0, 0], sizes = [8, 128], strides = [1, 1]} : vector<8x384xf32> to vector<8x128xf32>
    %161 = arith.addf %159, %160 : vector<8x128xf32>
    %162 = arith.negf %161 : vector<8x128xf32>
    %163 = math.exp %162 : vector<8x128xf32>
    %cst_56 = arith.constant 1.000000e+00 : f32
    %164 = vector.broadcast %cst_56 : f32 to vector<8x128xf32>
    %165 = arith.addf %164, %163 : vector<8x128xf32>
    %166 = arith.divf %164, %165 : vector<8x128xf32>
    %167 = vector.extract_strided_slice %157 {offsets = [0, 128], sizes = [8, 128], strides = [1, 1]} : vector<8x384xf32> to vector<8x128xf32>
    %168 = vector.extract_strided_slice %158 {offsets = [0, 128], sizes = [8, 128], strides = [1, 1]} : vector<8x384xf32> to vector<8x128xf32>
    %169 = arith.addf %167, %168 : vector<8x128xf32>
    %170 = arith.negf %169 : vector<8x128xf32>
    %171 = math.exp %170 : vector<8x128xf32>
    %cst_57 = arith.constant 1.000000e+00 : f32
    %172 = vector.broadcast %cst_57 : f32 to vector<8x128xf32>
    %173 = arith.addf %172, %171 : vector<8x128xf32>
    %174 = arith.divf %172, %173 : vector<8x128xf32>
    %175 = vector.extract_strided_slice %157 {offsets = [0, 256], sizes = [8, 128], strides = [1, 1]} : vector<8x384xf32> to vector<8x128xf32>
    %176 = vector.extract_strided_slice %158 {offsets = [0, 256], sizes = [8, 128], strides = [1, 1]} : vector<8x384xf32> to vector<8x128xf32>
    %177 = vector.broadcast %17 : vector<1x128xf32> to vector<8x128xf32>
    %178 = arith.addf %176, %177 : vector<8x128xf32>
    %179 = arith.mulf %166, %178 : vector<8x128xf32>
    %180 = arith.addf %175, %179 : vector<8x128xf32>
    %181 = math.tanh %180 : vector<8x128xf32>
    %182 = arith.subf %150, %181 : vector<8x128xf32>
    %183 = arith.mulf %174, %182 : vector<8x128xf32>
    %184 = arith.addf %181, %183 : vector<8x128xf32>
    %c0_58 = arith.constant 0 : index
    %185 = arith.index_cast %c4_i32 : i32 to index
    %c0_59 = arith.constant 0 : index
    %c0_60 = arith.constant 0 : index
    %186 = vector.load %arg8[%c0_58, %185, %c0_59, %c0_60] : memref<1x8x8x128xf32, #tpu.memory_space<vmem>>, vector<1x1x8x128xf32>
    %187 = vector.shape_cast %186 : vector<1x1x8x128xf32> to vector<8x128xf32>
    %188 = vector.shape_cast %184 : vector<8x128xf32> to vector<1x1x8x128xf32>
    tpu.vector_store %arg8[%c0_58, %185, %c0_59, %c0_60], %188 {strides = array<i32>} : memref<1x8x8x128xf32, #tpu.memory_space<vmem>>, vector<1x1x8x128xf32>,
    %c5_i32 = arith.constant 5 : i32
    %189 = arith.index_cast %c5_i32 : i32 to index
    %c0_61 = arith.constant 0 : index
    %c0_62 = arith.constant 0 : index
    %190 = vector.load %arg9[%189, %c0_61, %c0_62] : memref<8x8x384xf32, #tpu.memory_space<vmem>>, vector<1x8x384xf32>
    %191 = vector.shape_cast %190 : vector<1x8x384xf32> to vector<8x384xf32>
    %cst_63 = arith.constant dense<0.000000e+00> : vector<8x384xf32>
    %192 = tpu.matmul %184, %15, %cst_63 {dimension_numbers = #tpu.dot_dimension_numbers<[1], [0], [0], [1], [0, 0, 1, 1], [], []>} : vector<8x128xf32>, vector<128x384xf32>, vector<8x384xf32> -> vector<8x384xf32>
    %193 = vector.extract_strided_slice %191 {offsets = [0, 0], sizes = [8, 128], strides = [1, 1]} : vector<8x384xf32> to vector<8x128xf32>
    %194 = vector.extract_strided_slice %192 {offsets = [0, 0], sizes = [8, 128], strides = [1, 1]} : vector<8x384xf32> to vector<8x128xf32>
    %195 = arith.addf %193, %194 : vector<8x128xf32>
    %196 = arith.negf %195 : vector<8x128xf32>
    %197 = math.exp %196 : vector<8x128xf32>
    %cst_64 = arith.constant 1.000000e+00 : f32
    %198 = vector.broadcast %cst_64 : f32 to vector<8x128xf32>
    %199 = arith.addf %198, %197 : vector<8x128xf32>
    %200 = arith.divf %198, %199 : vector<8x128xf32>
    %201 = vector.extract_strided_slice %191 {offsets = [0, 128], sizes = [8, 128], strides = [1, 1]} : vector<8x384xf32> to vector<8x128xf32>
    %202 = vector.extract_strided_slice %192 {offsets = [0, 128], sizes = [8, 128], strides = [1, 1]} : vector<8x384xf32> to vector<8x128xf32>
    %203 = arith.addf %201, %202 : vector<8x128xf32>
    %204 = arith.negf %203 : vector<8x128xf32>
    %205 = math.exp %204 : vector<8x128xf32>
    %cst_65 = arith.constant 1.000000e+00 : f32
    %206 = vector.broadcast %cst_65 : f32 to vector<8x128xf32>
    %207 = arith.addf %206, %205 : vector<8x128xf32>
    %208 = arith.divf %206, %207 : vector<8x128xf32>
    %209 = vector.extract_strided_slice %191 {offsets = [0, 256], sizes = [8, 128], strides = [1, 1]} : vector<8x384xf32> to vector<8x128xf32>
    %210 = vector.extract_strided_slice %192 {offsets = [0, 256], sizes = [8, 128], strides = [1, 1]} : vector<8x384xf32> to vector<8x128xf32>
    %211 = vector.broadcast %17 : vector<1x128xf32> to vector<8x128xf32>
    %212 = arith.addf %210, %211 : vector<8x128xf32>
    %213 = arith.mulf %200, %212 : vector<8x128xf32>
    %214 = arith.addf %209, %213 : vector<8x128xf32>
    %215 = math.tanh %214 : vector<8x128xf32>
    %216 = arith.subf %184, %215 : vector<8x128xf32>
    %217 = arith.mulf %208, %216 : vector<8x128xf32>
    %218 = arith.addf %215, %217 : vector<8x128xf32>
    %c0_66 = arith.constant 0 : index
    %219 = arith.index_cast %c5_i32 : i32 to index
    %c0_67 = arith.constant 0 : index
    %c0_68 = arith.constant 0 : index
    %220 = vector.load %arg8[%c0_66, %219, %c0_67, %c0_68] : memref<1x8x8x128xf32, #tpu.memory_space<vmem>>, vector<1x1x8x128xf32>
    %221 = vector.shape_cast %220 : vector<1x1x8x128xf32> to vector<8x128xf32>
    %222 = vector.shape_cast %218 : vector<8x128xf32> to vector<1x1x8x128xf32>
    tpu.vector_store %arg8[%c0_66, %219, %c0_67, %c0_68], %222 {strides = array<i32>} : memref<1x8x8x128xf32, #tpu.memory_space<vmem>>, vector<1x1x8x128xf32>,
    %c6_i32 = arith.constant 6 : i32
    %223 = arith.index_cast %c6_i32 : i32 to index
    %c0_69 = arith.constant 0 : index
    %c0_70 = arith.constant 0 : index
    %224 = vector.load %arg9[%223, %c0_69, %c0_70] : memref<8x8x384xf32, #tpu.memory_space<vmem>>, vector<1x8x384xf32>
    %225 = vector.shape_cast %224 : vector<1x8x384xf32> to vector<8x384xf32>
    %cst_71 = arith.constant dense<0.000000e+00> : vector<8x384xf32>
    %226 = tpu.matmul %218, %15, %cst_71 {dimension_numbers = #tpu.dot_dimension_numbers<[1], [0], [0], [1], [0, 0, 1, 1], [], []>} : vector<8x128xf32>, vector<128x384xf32>, vector<8x384xf32> -> vector<8x384xf32>
    %227 = vector.extract_strided_slice %225 {offsets = [0, 0], sizes = [8, 128], strides = [1, 1]} : vector<8x384xf32> to vector<8x128xf32>
    %228 = vector.extract_strided_slice %226 {offsets = [0, 0], sizes = [8, 128], strides = [1, 1]} : vector<8x384xf32> to vector<8x128xf32>
    %229 = arith.addf %227, %228 : vector<8x128xf32>
    %230 = arith.negf %229 : vector<8x128xf32>
    %231 = math.exp %230 : vector<8x128xf32>
    %cst_72 = arith.constant 1.000000e+00 : f32
    %232 = vector.broadcast %cst_72 : f32 to vector<8x128xf32>
    %233 = arith.addf %232, %231 : vector<8x128xf32>
    %234 = arith.divf %232, %233 : vector<8x128xf32>
    %235 = vector.extract_strided_slice %225 {offsets = [0, 128], sizes = [8, 128], strides = [1, 1]} : vector<8x384xf32> to vector<8x128xf32>
    %236 = vector.extract_strided_slice %226 {offsets = [0, 128], sizes = [8, 128], strides = [1, 1]} : vector<8x384xf32> to vector<8x128xf32>
    %237 = arith.addf %235, %236 : vector<8x128xf32>
    %238 = arith.negf %237 : vector<8x128xf32>
    %239 = math.exp %238 : vector<8x128xf32>
    %cst_73 = arith.constant 1.000000e+00 : f32
    %240 = vector.broadcast %cst_73 : f32 to vector<8x128xf32>
    %241 = arith.addf %240, %239 : vector<8x128xf32>
    %242 = arith.divf %240, %241 : vector<8x128xf32>
    %243 = vector.extract_strided_slice %225 {offsets = [0, 256], sizes = [8, 128], strides = [1, 1]} : vector<8x384xf32> to vector<8x128xf32>
    %244 = vector.extract_strided_slice %226 {offsets = [0, 256], sizes = [8, 128], strides = [1, 1]} : vector<8x384xf32> to vector<8x128xf32>
    %245 = vector.broadcast %17 : vector<1x128xf32> to vector<8x128xf32>
    %246 = arith.addf %244, %245 : vector<8x128xf32>
    %247 = arith.mulf %234, %246 : vector<8x128xf32>
    %248 = arith.addf %243, %247 : vector<8x128xf32>
    %249 = math.tanh %248 : vector<8x128xf32>
    %250 = arith.subf %218, %249 : vector<8x128xf32>
    %251 = arith.mulf %242, %250 : vector<8x128xf32>
    %252 = arith.addf %249, %251 : vector<8x128xf32>
    %c0_74 = arith.constant 0 : index
    %253 = arith.index_cast %c6_i32 : i32 to index
    %c0_75 = arith.constant 0 : index
    %c0_76 = arith.constant 0 : index
    %254 = vector.load %arg8[%c0_74, %253, %c0_75, %c0_76] : memref<1x8x8x128xf32, #tpu.memory_space<vmem>>, vector<1x1x8x128xf32>
    %255 = vector.shape_cast %254 : vector<1x1x8x128xf32> to vector<8x128xf32>
    %256 = vector.shape_cast %252 : vector<8x128xf32> to vector<1x1x8x128xf32>
    tpu.vector_store %arg8[%c0_74, %253, %c0_75, %c0_76], %256 {strides = array<i32>} : memref<1x8x8x128xf32, #tpu.memory_space<vmem>>, vector<1x1x8x128xf32>,
    %c7_i32 = arith.constant 7 : i32
    %257 = arith.index_cast %c7_i32 : i32 to index
    %c0_77 = arith.constant 0 : index
    %c0_78 = arith.constant 0 : index
    %258 = vector.load %arg9[%257, %c0_77, %c0_78] : memref<8x8x384xf32, #tpu.memory_space<vmem>>, vector<1x8x384xf32>
    %259 = vector.shape_cast %258 : vector<1x8x384xf32> to vector<8x384xf32>
    %cst_79 = arith.constant dense<0.000000e+00> : vector<8x384xf32>
    %260 = tpu.matmul %252, %15, %cst_79 {dimension_numbers = #tpu.dot_dimension_numbers<[1], [0], [0], [1], [0, 0, 1, 1], [], []>} : vector<8x128xf32>, vector<128x384xf32>, vector<8x384xf32> -> vector<8x384xf32>
    %261 = vector.extract_strided_slice %259 {offsets = [0, 0], sizes = [8, 128], strides = [1, 1]} : vector<8x384xf32> to vector<8x128xf32>
    %262 = vector.extract_strided_slice %260 {offsets = [0, 0], sizes = [8, 128], strides = [1, 1]} : vector<8x384xf32> to vector<8x128xf32>
    %263 = arith.addf %261, %262 : vector<8x128xf32>
    %264 = arith.negf %263 : vector<8x128xf32>
    %265 = math.exp %264 : vector<8x128xf32>
    %cst_80 = arith.constant 1.000000e+00 : f32
    %266 = vector.broadcast %cst_80 : f32 to vector<8x128xf32>
    %267 = arith.addf %266, %265 : vector<8x128xf32>
    %268 = arith.divf %266, %267 : vector<8x128xf32>
    %269 = vector.extract_strided_slice %259 {offsets = [0, 128], sizes = [8, 128], strides = [1, 1]} : vector<8x384xf32> to vector<8x128xf32>
    %270 = vector.extract_strided_slice %260 {offsets = [0, 128], sizes = [8, 128], strides = [1, 1]} : vector<8x384xf32> to vector<8x128xf32>
    %271 = arith.addf %269, %270 : vector<8x128xf32>
    %272 = arith.negf %271 : vector<8x128xf32>
    %273 = math.exp %272 : vector<8x128xf32>
    %cst_81 = arith.constant 1.000000e+00 : f32
    %274 = vector.broadcast %cst_81 : f32 to vector<8x128xf32>
    %275 = arith.addf %274, %273 : vector<8x128xf32>
    %276 = arith.divf %274, %275 : vector<8x128xf32>
    %277 = vector.extract_strided_slice %259 {offsets = [0, 256], sizes = [8, 128], strides = [1, 1]} : vector<8x384xf32> to vector<8x128xf32>
    %278 = vector.extract_strided_slice %260 {offsets = [0, 256], sizes = [8, 128], strides = [1, 1]} : vector<8x384xf32> to vector<8x128xf32>
    %279 = vector.broadcast %17 : vector<1x128xf32> to vector<8x128xf32>
    %280 = arith.addf %278, %279 : vector<8x128xf32>
    %281 = arith.mulf %268, %280 : vector<8x128xf32>
    %282 = arith.addf %277, %281 : vector<8x128xf32>
    %283 = math.tanh %282 : vector<8x128xf32>
    %284 = arith.subf %252, %283 : vector<8x128xf32>
    %285 = arith.mulf %276, %284 : vector<8x128xf32>
    %286 = arith.addf %283, %285 : vector<8x128xf32>
    %c0_82 = arith.constant 0 : index
    %287 = arith.index_cast %c7_i32 : i32 to index
    %c0_83 = arith.constant 0 : index
    %c0_84 = arith.constant 0 : index
    %288 = vector.load %arg8[%c0_82, %287, %c0_83, %c0_84] : memref<1x8x8x128xf32, #tpu.memory_space<vmem>>, vector<1x1x8x128xf32>
    %289 = vector.shape_cast %288 : vector<1x1x8x128xf32> to vector<8x128xf32>
    %290 = vector.shape_cast %286 : vector<8x128xf32> to vector<1x1x8x128xf32>
    tpu.vector_store %arg8[%c0_82, %287, %c0_83, %c0_84], %290 {strides = array<i32>} : memref<1x8x8x128xf32, #tpu.memory_space<vmem>>, vector<1x1x8x128xf32>,
    %c8_i32 = arith.constant 8 : i32
    %c0_85 = arith.constant 0 : index
    %c0_86 = arith.constant 0 : index
    %291 = vector.load %arg10[%c0_85, %c0_86] : memref<8x128xf32, #tpu.memory_space<vmem>>, vector<8x128xf32>
    tpu.vector_store %arg10[%c0_85, %c0_86], %286 {strides = array<i32>} : memref<8x128xf32, #tpu.memory_space<vmem>>, vector<8x128xf32>,
    return
  }
  func.func @transform_0(%arg0: i32, %arg1: i32) -> (i32, i32, i32) {
    %c0_i32 = arith.constant 0 : i32
    %c0_i32_0 = arith.constant 0 : i32
    %c0_i32_1 = arith.constant 0 : i32
    return %arg1, %c0_i32, %c0_i32_0 : i32, i32, i32
  }
  func.func @transform_1(%arg0: i32, %arg1: i32) -> (i32, i32, i32) {
    %c0_i32 = arith.constant 0 : i32
    %c0_i32_0 = arith.constant 0 : i32
    %c0_i32_1 = arith.constant 0 : i32
    return %arg0, %c0_i32, %c0_i32_0 : i32, i32, i32
  }
  func.func @transform_2(%arg0: i32, %arg1: i32) -> (i32, i32, i32) {
    %c0_i32 = arith.constant 0 : i32
    %c0_i32_0 = arith.constant 0 : i32
    %c0_i32_1 = arith.constant 0 : i32
    return %arg0, %c0_i32, %c0_i32_0 : i32, i32, i32
  }
  func.func @transform_3(%arg0: i32, %arg1: i32) -> (i32, i32, i32) {
    %c0_i32 = arith.constant 0 : i32
    %c0_i32_0 = arith.constant 0 : i32
    %c0_i32_1 = arith.constant 0 : i32
    return %arg0, %c0_i32, %c0_i32_0 : i32, i32, i32
  }
  func.func @transform_4(%arg0: i32, %arg1: i32) -> (i32, i32, i32) {
    %c0_i32 = arith.constant 0 : i32
    %c0_i32_0 = arith.constant 0 : i32
    %c0_i32_1 = arith.constant 0 : i32
    return %arg0, %c0_i32, %c0_i32_0 : i32, i32, i32
  }
  func.func @transform_5(%arg0: i32, %arg1: i32) -> (i32, i32, i32) {
    %c0_i32 = arith.constant 0 : i32
    %c0_i32_0 = arith.constant 0 : i32
    %c0_i32_1 = arith.constant 0 : i32
    return %arg0, %c0_i32, %c0_i32_0 : i32, i32, i32
  }
  func.func @transform_6(%arg0: i32, %arg1: i32) -> (i32, i32, i32, i32) {
    %c0_i32 = arith.constant 0 : i32
    %c0_i32_0 = arith.constant 0 : i32
    %c0_i32_1 = arith.constant 0 : i32
    return %arg0, %arg1, %c0_i32, %c0_i32_0 : i32, i32, i32, i32
  }
}

</mosaic_0001>

<bundles_post_ra>
// kernel: custom-call
= control target key start
LH: loop header
LB: loop body
LE: loop exit
PB: predicated region body
PF: predicated region fallthrough
CT: control target
= control target key end

     0   :  { %s32_s0 = inlined_call_operand.vmem [shape: c64[2,8,16], index: 0, kind: input, shape index: {}]   ;;  %s33_s1 = inlined_call_operand.vmem [shape: f32[2,8,16], index: 1, kind: output, shape index: {}]  }
   0x1   :  { %v2_v0 = vld [vmem:[%s32_s0] sm:$0xff]  ;;  %v8_v1 = vld [vmem:[%s32_s0 + $0x8] sm:$0xff] }
   0x2   :  { %3 = vst [vmem:[%s33_s1] sm:$0xff] %v2_v0  ;;  %9 = vst [vmem:[%s33_s1 + $0x8] sm:$0xff] %v8_v1 }

// kernel: custom-call.1
= control target key start
LH: loop header
LB: loop body
LE: loop exit
PB: predicated region body
PF: predicated region fallthrough
CT: control target
= control target key end

     0   :  { %s35_s0 = inlined_call_operand.vmem [shape: c64[2,8,16], index: 0, kind: input, shape index: {}]   ;;  %s36_s1 = inlined_call_operand.vmem [shape: f32[2,8,16], index: 1, kind: output, shape index: {}]  }
   0x1   :  { %v10_v0 = vld [vmem:[%s35_s0 + $0x10] sm:$0xff]  ;;  %v11_v1 = vld [vmem:[%s35_s0 + $0x18] sm:$0xff] }
   0x2   :  { %4 = vst [vmem:[%s36_s1] sm:$0xff] %v10_v0  ;;  %12 = vst [vmem:[%s36_s1 + $0x8] sm:$0xff] %v11_v1 }

// kernel: custom-call.2
= control target key start
LH: loop header
LB: loop body
LE: loop exit
PB: predicated region body
PF: predicated region fallthrough
CT: control target
= control target key end

     0   :  { %s62_s0 = inlined_call_operand.vmem [shape: f32[2,8,32], index: 0, kind: input, shape index: {}]   ;;  %s63_s1 = inlined_call_operand.vmem [shape: f32[2,8,32], index: 1, kind: input, shape index: {}]   ;;  %s64_s2 = inlined_call_operand.vmem [shape: c64[2,8,32], index: 2, kind: output, shape index: {}]  }
   0x1   :  { %v5_v0 = vld [vmem:[%s62_s0] sm:$0xff]  ;;  %v18_v1 = vld [vmem:[%s62_s0 + $0x8] sm:$0xff] }
   0x2   :  { %v11_v2 = vld [vmem:[%s63_s1] sm:$0xff]  ;;  %6 = vst [vmem:[%s64_s2] sm:$0xff] %v5_v0  ;;  %19 = vst [vmem:[%s64_s2 + $0x8] sm:$0xff] %v18_v1  ;;  %v21_v3 = vld [vmem:[%s63_s1 + $0x8] sm:$0xff] }
   0x3   :  { %20 = vst [vmem:[%s64_s2 + $0x10] sm:$0xff] %v11_v2  ;;  %22 = vst [vmem:[%s64_s2 + $0x18] sm:$0xff] %v21_v3 }

// kernel: complex_gru_forward.1
= control target key start
LH: loop header
LB: loop body
LE: loop exit
PB: predicated region body
PF: predicated region fallthrough
CT: control target
= control target key end

     0   :  { %s3365_s21 = smov 0   ;;  %s3367_s22 = smov 0   ;;  %s3948_s0 = inlined_call_operand.vmem [shape: f32[8,8,16], index: 0, kind: input, shape index: {}]   ;;  %s3949_s1 = inlined_call_operand.vmem [shape: f32[2,8,128], index: 1, kind: input, shape index: {}]   ;;  %s3950_s2 = inlined_call_operand.vmem [shape: f32[2,16,384], index: 2, kind: input, shape index: {}]   ;;  %s3951_s3 = inlined_call_operand.vmem [shape: f32[2,128,384], index: 3, kind: input, shape index: {}]   ;;  %s3952_s4 = inlined_call_operand.vmem [shape: f32[2,1,384], index: 4, kind: input, shape index: {}]   ;;  %s3953_s5 = inlined_call_operand.vmem [shape: f32[2,1,128], index: 5, kind: input, shape index: {}]   ;;  %s3954_s6 = inlined_call_operand.vmem [shape: f32[2,8,8,128], index: 6, kind: output, shape index: {}]  }
   0x1   :  { %s3369_s23 = smov 0  }
   0x2 LB: > { %s28_s24 = sadd.s32 1, %s3321_s22  ;;  %p2214_p0 = scmp.ge.s32.totalorder %s3325_s23, 1  ;;  %s3325_s23 = sphi %s3369_s23, %s16_s23   ;;  %s3321_s22 = sphi %s3367_s22, %s3956_s22   ;;  %s3317_s21 = sphi %s3365_s21, %s3955_s21  }
   0x3   : > { %p30_p1 = scmp.ge.s32.totalorder %s28_s24, 2  ;;  %p273_p2 = scmp.lt.s32.totalorder %s3325_s23, 3 }
   0x5   : > { %s3958_s24 = smov (%p30_p1, %s28_s24), 0  ;;  %p274_p3 = pnand %p2214_p0, %p273_p2 }
   0x6   : > { %p334_p4 = scmp.lt.s32.totalorder (!%p274_p3), %s3317_s21, 1  ;;  %v371_v0 = vld [vmem:[%s3948_s0] sm:$0xff] (!%p274_p3)  ;;  %vm402_vm0 = vcmask (!%p274_p3), 130048   ;;  %v3327_v1 = vmov (!%p274_p3), 0.0   ;;  %v372_v21 = vld [vmem:[%s3948_s0 + $0x8] sm:$0xff] (!%p274_p3)  ;;  %v373_v33 = vld [vmem:[%s3948_s0 + $0x10] sm:$0xff] (!%p274_p3) }
   0x7   : > { %277 = sbr.rel (%p274_p3) target bundleno = 2146 (0x862), region = 44  ;;  %491 = vmatprep.mubr.f32.mxu0 (!%p274_p3), %v3327_v1  ;;  %2413 = vmatprep.mubr.msk.f32.mxu1 (!%p274_p3), %vm402_vm0, %v371_v0  ;;  %v3328_v41 = vmov (!%p274_p3), 0.0|0.0   ;;  %v374_v44 = vld [vmem:[%s3948_s0 + $0x18] sm:$0xff] (!%p274_p3)  ;;  %v375_v54 = vld [vmem:[%s3948_s0 + $0x20] sm:$0xff] (!%p274_p3)  ;;  %vm3329_vm1 = vmmov (!%p274_p3), 0  }
   0xe   : > { %s3960_s21 = smov (!%p334_p4, %s3317_s21), 1 }
   0xf   : > { %s3193_s27 = smul.u32 48, %s3960_s21  ;;  %s2215_s29 = sshll.u32 %s3960_s21, 3 }
  0x10   : > { %s3194_s28 = smul.u32 384, %s3960_s21  ;;  %s337_s8 = scalar_lea.vmem %s3949_s1, %s2215_s29 }
  0x11   : > { %s3395_s7 = scalar_lea.vmem %s3950_s2, %s3193_s27  ;;  %s3195_s9 = smul.u32 3, %s3960_s21 }
  0x12   : > { %s3400_s10 = scalar_lea.vmem %s3951_s3, %s3194_s28  ;;  %v380_v2 = vld [vmem:[%s3395_s7 + $0x8] sm:$0xff]  ;;  %v383_v3 = vld [vmem:[%s3395_s7 + $0x20] sm:$0xff]  ;;  %v382_v6 = vld [vmem:[%s3395_s7 + $0x18] sm:$0xff]  ;;  %s354_s15 = scalar_lea.vmem %s3953_s5, %s3960_s21 }
  0x13   : > { %v379_v4 = vld [vmem:[%s3395_s7] sm:$0xff]  ;;  %v2705_v5 = vpack.c.bf16 %v383_v3, %v380_v2  ;;  %v670_v7 = vld [vmem:[%s3400_s10 + $0x8] sm:$0xff]  ;;  %v672_v12 = vld [vmem:[%s3400_s10 + $0x18] sm:$0xff]  ;;  %s351_s12 = scalar_lea.vmem %s3952_s4, %s3195_s9  ;;  %s2262_s16 = sshll.u32 %s3960_s21, 6 }
  0x14   : > { %v673_v8 = vld [vmem:[%s3400_s10 + $0x20] sm:$0xff]  ;;  %v2707_v9 = vpack.c.bf16 %v382_v6, %v379_v4  ;;  %v676_v13 = vld [vmem:[%s3400_s10 + $0x38] sm:$0xff]  ;;  %v679_v14 = vld [vmem:[%s3400_s10 + $0x50] sm:$0xff]  ;;  %s3663_s19 = scalar_lea.vmem %s3954_s6, %s2262_s16 }
  0x15   : > { %v3408_v10 = vpack.c.bf16 %v673_v8, %v670_v7  ;;  %v669_v11 = vld [vmem:[%s3400_s10] sm:$0xff]  ;;  %2706 = vmatprep.subr.bf16.mxu0 %v2705_v5  ;;  %v3417_v16 = vpack.c.bf16 %v679_v14, %v676_v13  ;;  %v675_v17 = vld [vmem:[%s3400_s10 + $0x30] sm:$0xff]  ;;  %v678_v18 = vld [vmem:[%s3400_s10 + $0x48] sm:$0xff] }
  0x16   : > { %2708 = vmatpush1.bf16.msra.mxu0 %v2707_v9  ;;  %v3414_v15 = vpack.c.bf16 %v672_v12, %v669_v11  ;;  %v682_v19 = vld [vmem:[%s3400_s10 + $0x68] sm:$0xff]  ;;  %v685_v20 = vld [vmem:[%s3400_s10 + $0x80] sm:$0xff]  ;;  %v3429_v22 = vpack.c.bf16 %v678_v18, %v675_v17  ;;  %v684_v25 = vld [vmem:[%s3400_s10 + $0x78] sm:$0xff] }
  0x17   : > { %2714 = vmatprep.subr.bf16.mxu0 %v3408_v10  ;;  %v681_v23 = vld [vmem:[%s3400_s10 + $0x60] sm:$0xff]  ;;  %v3433_v24 = vpack.c.bf16 %v685_v20, %v682_v19  ;;  %v381_v26 = vld [vmem:[%s3395_s7 + $0x10] sm:$0xff]  ;;  %v384_v27 = vld [vmem:[%s3395_s7 + $0x28] sm:$0xff] }
  0x18   : > { %v688_v28 = vld [vmem:[%s3400_s10 + $0x98] sm:$0xff]  ;;  %v691_v29 = vld [vmem:[%s3400_s10 + $0xb0] sm:$0xff]  ;;  %v2709_v30 = vpack.c.bf16 %v384_v27, %v381_v26  ;;  %v674_v32 = vld [vmem:[%s3400_s10 + $0x28] sm:$0xff]  ;;  %v3448_v34 = vpack.c.bf16 %v684_v25, %v681_v23 }
  0x19   : > { %2220 = vmatmul.mubr.msk.f32.vlgmr.msra.gmra.mrb[0].mxu0 %vm402_vm0, %v371_v0  ;;  %v671_v31 = vld [vmem:[%s3400_s10 + $0x10] sm:$0xff]  ;;  %v3451_v35 = vpack.c.bf16 %v691_v29, %v688_v28  ;;  %v690_v37 = vld [vmem:[%s3400_s10 + $0xa8] sm:$0xff]  ;;  %v697_v39 = vld [vmem:[%s3400_s10 + $0xe0] sm:$0xff] }
  0x1a   : > { %2716 = vmatpush1.bf16.msra.mxu0 %v3414_v15  ;;  %497 = vmatprep.mubr.f32.mxu0 %v3327_v1  ;;  %v687_v36 = vld [vmem:[%s3400_s10 + $0x90] sm:$0xff]  ;;  %v694_v38 = vld [vmem:[%s3400_s10 + $0xc8] sm:$0xff]  ;;  %v3457_v40 = vpack.c.bf16 %v674_v32, %v671_v31  ;;  %v677_v42 = vld [vmem:[%s3400_s10 + $0x40] sm:$0xff] }
  0x1b   : > { %2718 = vmatprep.subr.bf16.mxu0 %v3417_v16  ;;  %2710 = vmatprep.subr.bf16.mxu1 %v2709_v30  ;;  %v680_v43 = vld [vmem:[%s3400_s10 + $0x58] sm:$0xff]  ;;  %v3468_v45 = vpack.c.bf16 %v690_v37, %v687_v36  ;;  %v3471_v46 = vpack.c.bf16 %v697_v39, %v694_v38  ;;  %v693_v47 = vld [vmem:[%s3400_s10 + $0xc0] sm:$0xff]  ;;  %v703_v50 = vld [vmem:[%s3400_s10 + $0x110] sm:$0xff]  ;;  %v387_v36 = vlaneseq }
  0x1c   : > { %2712 = vmatpush3.bf16.msra.mxu1 %v2709_v30  ;;  %v696_v48 = vld [vmem:[%s3400_s10 + $0xd8] sm:$0xff]  ;;  %v3479_v51 = vpack.c.bf16 %v680_v43, %v677_v42  ;;  %v683_v52 = vld [vmem:[%s3400_s10 + $0x70] sm:$0xff]  ;;  %v686_v53 = vld [vmem:[%s3400_s10 + $0x88] sm:$0xff] }
  0x1d   : > { %2221 = vmatmul.mubr.msk.f32.gmra.mrb[2].mxu0 %vm402_vm0, %v372_v21  ;;  %2745 = vmatprep.subr.bf16.mxu1 %v3328_v41  ;;  %v700_v49 = vld [vmem:[%s3400_s10 + $0xf8] sm:$0xff]  ;;  %v3491_v55 = vpack.c.bf16 %v696_v48, %v693_v47  ;;  %v699_v57 = vld [vmem:[%s3400_s10 + $0xf0] sm:$0xff]  ;;  %v702_v58 = vld [vmem:[%s3400_s10 + $0x108] sm:$0xff]  ;;  %v3502_v61 = vpack.c.bf16 %v686_v53, %v683_v52  ;;  %v388_v37 = vshrl.u32 %v387_v36, 7 }
  0x1e   : > { %2720 = vmatpush1.bf16.msra.mxu0 %v3429_v22  ;;  %503 = vmatprep.mubr.f32.mxu0 %v3327_v1  ;;  %v3494_v56 = vpack.c.bf16 %v703_v50, %v700_v49  ;;  %v706_v59 = vld [vmem:[%s3400_s10 + $0x128] sm:$0xff]  ;;  %v709_v60 = vld [vmem:[%s3400_s10 + $0x140] sm:$0xff]  ;;  %v692_v63 = vld [vmem:[%s3400_s10 + $0xb8] sm:$0xff]  ;;  %v3514_v2 = vpack.c.bf16 %v702_v58, %v699_v57 }
  0x1f   : > { %2722 = vmatprep.subr.bf16.mxu0 %v3433_v24  ;;  %2414 = vmatmul.mubr.msk.f32.vlgmr.msra.gmra.mrb[0].mxu1 %vm402_vm0, %v372_v21  ;;  %v689_v62 = vld [vmem:[%s3400_s10 + $0xa0] sm:$0xff]  ;;  %v376_v0 = vld [vmem:[%s3948_s0 + $0x28] sm:$0xff]  ;;  %v377_v3 = vld [vmem:[%s3948_s0 + $0x30] sm:$0xff]  ;;  %v3520_v4 = vpack.c.bf16 %v709_v60, %v706_v59  ;;  %v397_v38 = vsub.s32 2, %v388_v37 }
  0x20   : > { %2747 = vmatpush3.bf16.msra.mxu1 %v3457_v40  ;;  %2416 = vmatprep.mubr.msk.f32.mxu1 %vm402_vm0, %v373_v33  ;;  %v705_v5 = vld [vmem:[%s3400_s10 + $0x120] sm:$0xff]  ;;  %v708_v6 = vld [vmem:[%s3400_s10 + $0x138] sm:$0xff]  ;;  %v715_v8 = vld [vmem:[%s3400_s10 + $0x170] sm:$0xff]  ;;  %v3528_v9 = vpack.c.bf16 %v692_v63, %v689_v62 }
  0x21   : > { %2222 = vmatmul.mubr.msk.f32.gmra.mrb[4].mxu0 %vm402_vm0, %v373_v33  ;;  %2748 = vmatprep.subr.bf16.mxu1 %v3328_v41  ;;  %v712_v7 = vld [vmem:[%s3400_s10 + $0x158] sm:$0xff]  ;;  %v695_v11 = vld [vmem:[%s3400_s10 + $0xd0] sm:$0xff]  ;;  %v698_v12 = vld [vmem:[%s3400_s10 + $0xe8] sm:$0xff]  ;;  %v3537_v13 = vpack.c.bf16 %v708_v6, %v705_v5 }
  0x22   : > { %2724 = vmatpush1.bf16.msra.mxu0 %v3448_v34  ;;  %509 = vmatprep.mubr.f32.mxu0 %v3327_v1  ;;  %v378_v14 = vld [vmem:[%s3948_s0 + $0x38] sm:$0xff]  ;;  %v3543_v17 = vpack.c.bf16 %v715_v8, %v712_v7  ;;  %v711_v18 = vld [vmem:[%s3400_s10 + $0x150] sm:$0xff]  ;;  %v714_v19 = vld [vmem:[%s3400_s10 + $0x168] sm:$0xff]  ;;  %v3550_v20 = vpack.c.bf16 %v698_v12, %v695_v11  ;;  %v393_v7 = vsub.s32 1, %v388_v37 }
  0x23   : > { %2726 = vmatprep.subr.bf16.mxu0 %v3451_v35  ;;  %2417 = vmatmul.mubr.msk.f32.gmra.mrb[2].mxu1 %vm402_vm0, %v374_v44  ;;  %v701_v21 = vld [vmem:[%s3400_s10 + $0x100] sm:$0xff]  ;;  %v704_v23 = vld [vmem:[%s3400_s10 + $0x118] sm:$0xff]  ;;  %v3560_v25 = vpack.c.bf16 %v714_v19, %v711_v18  ;;  %v707_v27 = vld [vmem:[%s3400_s10 + $0x130] sm:$0xff] }
  0x24   : > { %2750 = vmatpush3.bf16.msra.mxu1 %v3479_v51  ;;  %2419 = vmatprep.mubr.msk.f32.mxu1 %vm402_vm0, %v375_v54  ;;  %v3567_v26 = vpack.c.bf16 %v704_v23, %v701_v21  ;;  %v710_v28 = vld [vmem:[%s3400_s10 + $0x148] sm:$0xff]  ;;  %v3575_v29 = vld [vmem:[%s337_s8] sm:$0xff]  ;;  %v716_v32 = vld [vmem:[%s3400_s10 + $0x178] sm:$0xff] }
  0x25   : > { %2223 = vmatmul.mubr.msk.f32.gmra.mrb[6].mxu0 %vm402_vm0, %v374_v44  ;;  %2751 = vmatprep.subr.bf16.mxu1 %v3328_v41  ;;  %v3579_v30 = vpack.c.bf16 %v710_v28, %v707_v27  ;;  %v713_v31 = vld [vmem:[%s3400_s10 + $0x160] sm:$0xff] }
  0x26   : > { %2728 = vmatpush1.bf16.msra.mxu0 %v3468_v45  ;;  %515 = vmatprep.mubr.f32.mxu0 %v3327_v1  ;;  %v3589_v33 = vpack.c.bf16 %v716_v32, %v713_v31  ;;  %v385_v39 = vld [vmem:[%s351_s12] sm:$0x7] }
  0x27   : > { %2730 = vmatprep.subr.bf16.mxu0 %v3471_v46  ;;  %2420 = vmatmul.mubr.msk.f32.gmra.mrb[4].mxu1 %vm402_vm0, %v376_v0  ;;  %v398_v42 = vrot.slane %v385_v39, %v397_v38  ;;  %v3648_v12 = vrot.slane %v385_v39, %v393_v7  ;;  %v3655_v28 = vld [vmem:[%s354_s15] ss:$0 sm:$0xff] }
  0x28   : > { %2753 = vmatpush3.bf16.msra.mxu1 %v3502_v61  ;;  %2422 = vmatprep.mubr.msk.f32.mxu1 %vm402_vm0, %v377_v3 }
  0x29   : > { %2224 = vmatmul.mubr.msk.f32.gmra.mrb[8].mxu0 %vm402_vm0, %v375_v54  ;;  %2754 = vmatprep.subr.bf16.mxu1 %v3328_v41 }
  0x2a   : > { %2732 = vmatpush1.bf16.msra.mxu0 %v3491_v55  ;;  %521 = vmatprep.mubr.f32.mxu0 %v3327_v1 }
  0x2b   : > { %2734 = vmatprep.subr.bf16.mxu0 %v3494_v56  ;;  %2423 = vmatmul.mubr.msk.f32.gmra.mrb[6].mxu1 %vm402_vm0, %v378_v14 }
  0x2c   : > { %2756 = vmatpush3.bf16.msra.mxu1 %v3528_v9  ;;  %2457 = vmatprep.mubr.msk.f32.mxu1 %vm3329_vm1, %v3327_v1 }
  0x2d   : > { %2225 = vmatmul.mubr.msk.f32.gmra.mrb[10].mxu0 %vm402_vm0, %v376_v0  ;;  %2757 = vmatprep.subr.bf16.mxu1 %v3328_v41  ;;  %v389_v0 = vsub.s32 0, %v388_v37 }
  0x2e   : > { %2736 = vmatpush1.bf16.msra.mxu0 %v3514_v2  ;;  %527 = vmatprep.mubr.f32.mxu0 %v3327_v1 }
  0x2f   : > { %2738 = vmatprep.subr.bf16.mxu0 %v3520_v4 }
  0x30   : > { %2759 = vmatpush3.bf16.msra.mxu1 %v3550_v20 }
  0x31   : > { %2226 = vmatmul.mubr.msk.f32.gmra.mrb[12].mxu0 %vm402_vm0, %v377_v3  ;;  %2760 = vmatprep.subr.bf16.mxu1 %v3328_v41  ;;  %v3645_v3 = vrot.slane %v385_v39, %v389_v0 }
  0x32   : > { %2740 = vmatpush1.bf16.msra.mxu0 %v3537_v13  ;;  %533 = vmatprep.mubr.f32.mxu0 %v3327_v1 }
  0x33   : > { %2742 = vmatprep.subr.bf16.mxu0 %v3543_v17 }
  0x34   : > { %2762 = vmatpush3.bf16.msra.mxu1 %v3567_v26 }
  0x35   : > { %2227 = vmatmul.mubr.msk.f32.gmra.mrb[14].mxu0 %vm402_vm0, %v378_v14  ;;  %2763 = vmatprep.subr.bf16.mxu1 %v3328_v41 }
  0x36   : > { %2744 = vmatpush1.bf16.msra.mxu0 %v3560_v25  ;;  %786 = vmatprep.mubr.f32.mxu0 %v3327_v1 }
  0x37   : > { %2770 = vmatprep.subr.bf16.mxu0 %v3408_v10 }
  0x38   : > { %2765 = vmatpush3.bf16.msra.mxu1 %v3579_v30 }
  0x39   : > { %787 = vmatmul.mubr.f32.vlgmr.msra.gmra.mrb[0].mxu0 %v3575_v29  ;;  %2766 = vmatprep.subr.bf16.mxu1 %v3328_v41 }
  0x3a   : > { %2772 = vmatpush1.bf16.msra.mxu0 %v3414_v15  ;;  %959 = vmatprep.mubr.f32.mxu0 %v3327_v1 }
  0x3b   : > { %2774 = vmatprep.subr.bf16.mxu0 %v3417_v16 }
  0x3c   : > { %2768 = vmatpush3.bf16.msra.mxu1 %v3589_v33 }
  0x3d   : > { %2801 = vmatprep.subr.bf16.mxu1 %v3328_v41 }
  0x3e   : > { %2776 = vmatpush1.bf16.msra.mxu0 %v3429_v22 }
  0x3f   : > { %2778 = vmatprep.subr.bf16.mxu0 %v3433_v24  ;;  %2458 = vmatmul.mubr.f32.vlgmr.msra.gmra.mrb[8].mxu1 %v3575_v29 }
  0x40   : > { %2803 = vmatpush3.bf16.msra.mxu1 %v3457_v40  ;;  %2492 = vmatprep.mubr.msk.f32.mxu1 %vm3329_vm1, %v3327_v1 }
  0x41   : > { %2804 = vmatprep.subr.bf16.mxu1 %v3328_v41 }
  0x42   : > { %2780 = vmatpush1.bf16.msra.mxu0 %v3448_v34 }
  0x43   : > { %2782 = vmatprep.subr.bf16.mxu0 %v3451_v35 }
  0x44   : > { %2806 = vmatpush3.bf16.msra.mxu1 %v3479_v51 }
  0x45   : > { %2807 = vmatprep.subr.bf16.mxu1 %v3328_v41 }
  0x46   : > { %2784 = vmatpush1.bf16.msra.mxu0 %v3468_v45 }
  0x47   : > { %2786 = vmatprep.subr.bf16.mxu0 %v3471_v46 }
  0x48   : > { %2809 = vmatpush3.bf16.msra.mxu1 %v3502_v61 }
  0x49   : > { %2810 = vmatprep.subr.bf16.mxu1 %v3328_v41 }
  0x4a   : > { %2788 = vmatpush1.bf16.msra.mxu0 %v3491_v55 }
  0x4b   : > { %2790 = vmatprep.subr.bf16.mxu0 %v3494_v56 }
  0x4c   : > { %2812 = vmatpush3.bf16.msra.mxu1 %v3528_v9 }
  0x4d   : > { %2813 = vmatprep.subr.bf16.mxu1 %v3328_v41 }
  0x4e   : > { %2792 = vmatpush1.bf16.msra.mxu0 %v3514_v2 }
  0x4f   : > { %2794 = vmatprep.subr.bf16.mxu0 %v3520_v4 }
  0x50   : > { %2815 = vmatpush3.bf16.msra.mxu1 %v3550_v20 }
  0x51   : > { %2816 = vmatprep.subr.bf16.mxu1 %v3328_v41 }
  0x52   : > { %2796 = vmatpush1.bf16.msra.mxu0 %v3537_v13 }
  0x53   : > { %2798 = vmatprep.subr.bf16.mxu0 %v3543_v17 }
  0x54   : > { %2818 = vmatpush3.bf16.msra.mxu1 %v3567_v26 }
  0x55   : > { %2819 = vmatprep.subr.bf16.mxu1 %v3328_v41 }
  0x56   : > { %2800 = vmatpush1.bf16.msra.mxu0 %v3560_v25 }
  0x57   : > { %2826 = vmatprep.subr.bf16.mxu0 %v3408_v10 }
  0x58   : > { %2821 = vmatpush3.bf16.msra.mxu1 %v3579_v30 }
  0x59   : > { %2822 = vmatprep.subr.bf16.mxu1 %v3328_v41 }
  0x5c   : > { %2824 = vmatpush3.bf16.msra.mxu1 %v3589_v33 }
  0x5d   : > { %2857 = vmatprep.subr.bf16.mxu1 %v3328_v41 }
  0xf2   : > { %v2415_v43 = vpop.f32.mrb[0].mxu1 }
  0xf3   : > { %v3631_v44 = vadd.f32 %v2415_v43, %v398_v42  ;;  %v606_v47 = vpop.f32.mrb[1].mxu1 }
  0xf4   : > { %v607_v37 = vadd.f32 %v606_v47, %v398_v42 }
  0xf6   : > { %v2418_v48 = vpop.f32.mrb[2].mxu1 }
  0xf7   : > { %v3633_v49 = vadd.f32 %v2418_v48, %v398_v42  ;;  %v616_v50 = vpop.f32.mrb[3].mxu1 }
  0xf8   : > { %v3635_v52 = vadd.f32 %v616_v50, %v398_v42 }
  0xfa   : > { %v2421_v53 = vpop.f32.mrb[4].mxu1 }
  0xfb   : > { %v3637_v54 = vadd.f32 %v2421_v53, %v398_v42  ;;  %v626_v57 = vpop.f32.mrb[5].mxu1 }
  0xfc   : > { %v3639_v58 = vadd.f32 %v626_v57, %v398_v42 }
  0xfe   : > { %v2424_v59 = vpop.f32.mrb[6].mxu1 }
  0xff   : > { %v3641_v60 = vadd.f32 %v2424_v59, %v398_v42  ;;  %v636_v62 = vpop.f32.mrb[7].mxu1 }
 0x100   : > { %v3643_v63 = vadd.f32 %v636_v62, %v398_v42 }
 0x10c   : > { %v788_v5 = vpop.f32.mrb[0].mxu0 }
 0x10d   : > { %v3161_v6 = vadd.f32 %v788_v5, %v3645_v3  ;;  %v790_v8 = vpop.f32.mrb[1].mxu0 }
 0x10e   : > { %v3162_v14 = vadd.f32 %v790_v8, %v3648_v12 }
 0x10f   : > { %v2236_v11 = vmul.f32 -1.442695, %v3161_v6 }
 0x110   : > { %v2237_v21 = vmul.f32 -1.442695, %v3162_v14 }
 0x111   : > { %3223 = vpow2.f32 %v2236_v11 }
 0x112   : > { %v859_v18 = vpop.f32.mrb[8].mxu1  ;;  %3225 = vpow2.f32 %v2237_v21 }
 0x113   : > { %v2459_v19 = vpop.f32.mrb[9].mxu1  ;;  %v883_v31 = vadd.f32 %v3655_v28, %v859_v18 }
 0x11b   : > { %v3224_v23 = vpop.eup %3223 }
 0x11c   : > { %v867_v27 = vadd.f32 1.0, %v3224_v23  ;;  %v3226_v32 = vpop.eup %3225 }
 0x11d   : > { %v874_v39 = vadd.f32 1.0, %v3226_v32 }
 0x11e   : > { %3227 = vrcp.f32 %v867_v27 }
 0x128   : > { %v3228_v36 = vpop.eup %3227 }
 0x129   : > { %v884_v38 = vmul.f32 %v3228_v36, %v883_v31 }
 0x12b   : > { %v885_v43 = vadd.f32 %v884_v38, %v607_v37 }
 0x12d   : > { %3229 = vtanh.f32 %v885_v43 }
 0x12e   : > { %3231 = vrcp.f32 %v874_v39 }
 0x137   : > { %v3230_v48 = vpop.eup %3229 }
 0x138   : > { %v887_v50 = vsub.f32 %v3575_v29, %v3230_v48  ;;  %v3232_v53 = vpop.eup %3231 }
 0x13a   : > { %v888_v57 = vmul.f32 %v3232_v53, %v887_v50 }
 0x13c   : > { %v3665_v59 = vadd.f32 %v3230_v48, %v888_v57 }
 0x13e   : > { %890 = vst [vmem:[%s3663_s19] sm:$0xff] %v3665_v59  ;;  %960 = vmatmul.mubr.f32.vlgmr.msra.gmra.mrb[2].mxu0 %v3665_v59  ;;  %2493 = vmatmul.mubr.f32.vlgmr.msra.gmra.mrb[10].mxu1 %v3665_v59 }
 0x13f   : > { %2828 = vmatpush1.bf16.msra.mxu0 %v3414_v15  ;;  %2859 = vmatpush3.bf16.msra.mxu1 %v3457_v40 }
 0x140   : > { %2830 = vmatprep.subr.bf16.mxu0 %v3417_v16  ;;  %2860 = vmatprep.subr.bf16.mxu1 %v3328_v41 }
 0x141   : > { %1127 = vmatprep.mubr.f32.mxu0 %v3327_v1  ;;  %2527 = vmatprep.mubr.msk.f32.mxu1 %vm3329_vm1, %v3327_v1 }
 0x143   : > { %2832 = vmatpush1.bf16.msra.mxu0 %v3429_v22  ;;  %2862 = vmatpush3.bf16.msra.mxu1 %v3479_v51 }
 0x144   : > { %2834 = vmatprep.subr.bf16.mxu0 %v3433_v24  ;;  %2863 = vmatprep.subr.bf16.mxu1 %v3328_v41 }
 0x147   : > { %2836 = vmatpush1.bf16.msra.mxu0 %v3448_v34  ;;  %2865 = vmatpush3.bf16.msra.mxu1 %v3502_v61 }
 0x148   : > { %2838 = vmatprep.subr.bf16.mxu0 %v3451_v35  ;;  %2866 = vmatprep.subr.bf16.mxu1 %v3328_v41 }
 0x14b   : > { %2840 = vmatpush1.bf16.msra.mxu0 %v3468_v45  ;;  %2868 = vmatpush3.bf16.msra.mxu1 %v3528_v9 }
 0x14c   : > { %2842 = vmatprep.subr.bf16.mxu0 %v3471_v46  ;;  %2869 = vmatprep.subr.bf16.mxu1 %v3328_v41 }
 0x14f   : > { %2844 = vmatpush1.bf16.msra.mxu0 %v3491_v55  ;;  %2871 = vmatpush3.bf16.msra.mxu1 %v3550_v20 }
 0x150   : > { %2846 = vmatprep.subr.bf16.mxu0 %v3494_v56  ;;  %2872 = vmatprep.subr.bf16.mxu1 %v3328_v41 }
 0x153   : > { %2848 = vmatpush1.bf16.msra.mxu0 %v3514_v2  ;;  %2874 = vmatpush3.bf16.msra.mxu1 %v3567_v26 }
 0x154   : > { %2850 = vmatprep.subr.bf16.mxu0 %v3520_v4  ;;  %2875 = vmatprep.subr.bf16.mxu1 %v3328_v41 }
 0x157   : > { %2852 = vmatpush1.bf16.msra.mxu0 %v3537_v13  ;;  %2877 = vmatpush3.bf16.msra.mxu1 %v3579_v30 }
 0x158   : > { %2854 = vmatprep.subr.bf16.mxu0 %v3543_v17  ;;  %2878 = vmatprep.subr.bf16.mxu1 %v3328_v41 }
 0x15b   : > { %2856 = vmatpush1.bf16.msra.mxu0 %v3560_v25  ;;  %2880 = vmatpush3.bf16.msra.mxu1 %v3589_v33 }
 0x15c   : > { %2882 = vmatprep.subr.bf16.mxu0 %v3408_v10  ;;  %2913 = vmatprep.subr.bf16.mxu1 %v3328_v41 }
 0x211   : > { %v961_v29 = vpop.f32.mrb[2].mxu0  ;;  %v1032_v42 = vpop.f32.mrb[10].mxu1 }
 0x212   : > { %v3163_v47 = vadd.f32 %v961_v29, %v3645_v3  ;;  %v963_v62 = vpop.f32.mrb[3].mxu0  ;;  %v2494_v0 = vpop.f32.mrb[11].mxu1  ;;  %v1050_v18 = vadd.f32 %v3655_v28, %v1032_v42 }
 0x213   : > { %v3164_v6 = vadd.f32 %v963_v62, %v3648_v12 }
 0x214   : > { %v2239_v5 = vmul.f32 -1.442695, %v3163_v47 }
 0x215   : > { %v2240_v7 = vmul.f32 -1.442695, %v3164_v6 }
 0x216   : > { %3233 = vpow2.f32 %v2239_v5 }
 0x217   : > { %3235 = vpow2.f32 %v2240_v7 }
 0x220   : > { %v3234_v8 = vpop.eup %3233 }
 0x221   : > { %v1040_v11 = vadd.f32 1.0, %v3234_v8  ;;  %v3236_v14 = vpop.eup %3235 }
 0x222   : > { %v1047_v27 = vadd.f32 1.0, %v3236_v14 }
 0x223   : > { %3237 = vrcp.f32 %v1040_v11 }
 0x22d   : > { %v3238_v19 = vpop.eup %3237 }
 0x22e   : > { %v1051_v21 = vmul.f32 %v3238_v19, %v1050_v18 }
 0x230   : > { %v1052_v23 = vadd.f32 %v1051_v21, %v3631_v44 }
 0x232   : > { %3239 = vtanh.f32 %v1052_v23 }
 0x233   : > { %3241 = vrcp.f32 %v1047_v27 }
 0x23c   : > { %v3240_v31 = vpop.eup %3239 }
 0x23d   : > { %v1054_v32 = vsub.f32 %v3665_v59, %v3240_v31  ;;  %v3242_v36 = vpop.eup %3241 }
 0x23f   : > { %v1055_v37 = vmul.f32 %v3242_v36, %v1054_v32 }
 0x241   : > { %v3711_v38 = vadd.f32 %v3240_v31, %v1055_v37 }
 0x243   : > { %2241 = vst [vmem:[%s3663_s19 + $0x8] sm:$0xff] %v3711_v38  ;;  %1128 = vmatmul.mubr.f32.vlgmr.msra.gmra.mrb[4].mxu0 %v3711_v38  ;;  %2528 = vmatmul.mubr.f32.vlgmr.msra.gmra.mrb[12].mxu1 %v3711_v38 }
 0x244   : > { %2884 = vmatpush1.bf16.msra.mxu0 %v3414_v15  ;;  %2915 = vmatpush3.bf16.msra.mxu1 %v3457_v40 }
 0x245   : > { %2886 = vmatprep.subr.bf16.mxu0 %v3417_v16  ;;  %2916 = vmatprep.subr.bf16.mxu1 %v3328_v41 }
 0x246   : > { %1295 = vmatprep.mubr.f32.mxu0 %v3327_v1  ;;  %2562 = vmatprep.mubr.msk.f32.mxu1 %vm3329_vm1, %v3327_v1 }
 0x248   : > { %2888 = vmatpush1.bf16.msra.mxu0 %v3429_v22  ;;  %2918 = vmatpush3.bf16.msra.mxu1 %v3479_v51 }
 0x249   : > { %2890 = vmatprep.subr.bf16.mxu0 %v3433_v24  ;;  %2919 = vmatprep.subr.bf16.mxu1 %v3328_v41 }
 0x24c   : > { %2892 = vmatpush1.bf16.msra.mxu0 %v3448_v34  ;;  %2921 = vmatpush3.bf16.msra.mxu1 %v3502_v61 }
 0x24d   : > { %2894 = vmatprep.subr.bf16.mxu0 %v3451_v35  ;;  %2922 = vmatprep.subr.bf16.mxu1 %v3328_v41 }
 0x250   : > { %2896 = vmatpush1.bf16.msra.mxu0 %v3468_v45  ;;  %2924 = vmatpush3.bf16.msra.mxu1 %v3528_v9 }
 0x251   : > { %2898 = vmatprep.subr.bf16.mxu0 %v3471_v46  ;;  %2925 = vmatprep.subr.bf16.mxu1 %v3328_v41 }
 0x254   : > { %2900 = vmatpush1.bf16.msra.mxu0 %v3491_v55  ;;  %2927 = vmatpush3.bf16.msra.mxu1 %v3550_v20 }
 0x255   : > { %2902 = vmatprep.subr.bf16.mxu0 %v3494_v56  ;;  %2928 = vmatprep.subr.bf16.mxu1 %v3328_v41 }
 0x258   : > { %2904 = vmatpush1.bf16.msra.mxu0 %v3514_v2  ;;  %2930 = vmatpush3.bf16.msra.mxu1 %v3567_v26 }
 0x259   : > { %2906 = vmatprep.subr.bf16.mxu0 %v3520_v4  ;;  %2931 = vmatprep.subr.bf16.mxu1 %v3328_v41 }
 0x25c   : > { %2908 = vmatpush1.bf16.msra.mxu0 %v3537_v13  ;;  %2933 = vmatpush3.bf16.msra.mxu1 %v3579_v30 }
 0x25d   : > { %2910 = vmatprep.subr.bf16.mxu0 %v3543_v17  ;;  %2934 = vmatprep.subr.bf16.mxu1 %v3328_v41 }
 0x260   : > { %2912 = vmatpush1.bf16.msra.mxu0 %v3560_v25  ;;  %2936 = vmatpush3.bf16.msra.mxu1 %v3589_v33 }
 0x261   : > { %2938 = vmatprep.subr.bf16.mxu0 %v3408_v10  ;;  %2969 = vmatprep.subr.bf16.mxu1 %v3328_v41 }
 0x316   : > { %v1129_v44 = vpop.f32.mrb[4].mxu0  ;;  %v1200_v39 = vpop.f32.mrb[12].mxu1 }
 0x317   : > { %v3165_v43 = vadd.f32 %v1129_v44, %v3645_v3  ;;  %v1131_v48 = vpop.f32.mrb[5].mxu0  ;;  %v2529_v50 = vpop.f32.mrb[13].mxu1  ;;  %v1218_v62 = vadd.f32 %v3655_v28, %v1200_v39 }
 0x318   : > { %v3166_v57 = vadd.f32 %v1131_v48, %v3648_v12 }
 0x319   : > { %v2242_v53 = vmul.f32 -1.442695, %v3165_v43 }
 0x31a   : > { %v2243_v59 = vmul.f32 -1.442695, %v3166_v57 }
 0x31b   : > { %3243 = vpow2.f32 %v2242_v53 }
 0x31c   : > { %3245 = vpow2.f32 %v2243_v59 }
 0x325   : > { %v3244_v29 = vpop.eup %3243 }
 0x326   : > { %v1208_v42 = vadd.f32 1.0, %v3244_v29  ;;  %v3246_v47 = vpop.eup %3245 }
 0x327   : > { %v1215_v7 = vadd.f32 1.0, %v3246_v47 }
 0x328   : > { %3247 = vrcp.f32 %v1208_v42 }
 0x332   : > { %v3248_v0 = vpop.eup %3247 }
 0x333   : > { %v1219_v5 = vmul.f32 %v3248_v0, %v1218_v62 }
 0x335   : > { %v1220_v6 = vadd.f32 %v1219_v5, %v3635_v52 }
 0x337   : > { %3249 = vtanh.f32 %v1220_v6 }
 0x338   : > { %3251 = vrcp.f32 %v1215_v7 }
 0x341   : > { %v3250_v8 = vpop.eup %3249 }
 0x342   : > { %v1222_v11 = vsub.f32 %v3711_v38, %v3250_v8  ;;  %v3252_v14 = vpop.eup %3251 }
 0x344   : > { %v1223_v18 = vmul.f32 %v3252_v14, %v1222_v11 }
 0x346   : > { %v3757_v19 = vadd.f32 %v3250_v8, %v1223_v18 }
 0x348   : > { %2244 = vst [vmem:[%s3663_s19 + $0x10] sm:$0xff] %v3757_v19  ;;  %1296 = vmatmul.mubr.f32.vlgmr.msra.gmra.mrb[6].mxu0 %v3757_v19  ;;  %2563 = vmatmul.mubr.f32.vlgmr.msra.gmra.mrb[14].mxu1 %v3757_v19 }
 0x349   : > { %2940 = vmatpush1.bf16.msra.mxu0 %v3414_v15  ;;  %2971 = vmatpush3.bf16.msra.mxu1 %v3457_v40 }
 0x34a   : > { %2942 = vmatprep.subr.bf16.mxu0 %v3417_v16  ;;  %2972 = vmatprep.subr.bf16.mxu1 %v3328_v41 }
 0x34b   : > { %1463 = vmatprep.mubr.f32.mxu0 %v3327_v1  ;;  %2597 = vmatprep.mubr.msk.f32.mxu1 %vm3329_vm1, %v3327_v1 }
 0x34d   : > { %2944 = vmatpush1.bf16.msra.mxu0 %v3429_v22  ;;  %2974 = vmatpush3.bf16.msra.mxu1 %v3479_v51 }
 0x34e   : > { %2946 = vmatprep.subr.bf16.mxu0 %v3433_v24  ;;  %2975 = vmatprep.subr.bf16.mxu1 %v3328_v41 }
 0x351   : > { %2948 = vmatpush1.bf16.msra.mxu0 %v3448_v34  ;;  %2977 = vmatpush3.bf16.msra.mxu1 %v3502_v61 }
 0x352   : > { %2950 = vmatprep.subr.bf16.mxu0 %v3451_v35  ;;  %2978 = vmatprep.subr.bf16.mxu1 %v3328_v41 }
 0x355   : > { %2952 = vmatpush1.bf16.msra.mxu0 %v3468_v45  ;;  %2980 = vmatpush3.bf16.msra.mxu1 %v3528_v9 }
 0x356   : > { %2954 = vmatprep.subr.bf16.mxu0 %v3471_v46  ;;  %2981 = vmatprep.subr.bf16.mxu1 %v3328_v41 }
 0x359   : > { %2956 = vmatpush1.bf16.msra.mxu0 %v3491_v55  ;;  %2983 = vmatpush3.bf16.msra.mxu1 %v3550_v20 }
 0x35a   : > { %2958 = vmatprep.subr.bf16.mxu0 %v3494_v56  ;;  %2984 = vmatprep.subr.bf16.mxu1 %v3328_v41 }
 0x35d   : > { %2960 = vmatpush1.bf16.msra.mxu0 %v3514_v2  ;;  %2986 = vmatpush3.bf16.msra.mxu1 %v3567_v26 }
 0x35e   : > { %2962 = vmatprep.subr.bf16.mxu0 %v3520_v4  ;;  %2987 = vmatprep.subr.bf16.mxu1 %v3328_v41 }
 0x361   : > { %2964 = vmatpush1.bf16.msra.mxu0 %v3537_v13  ;;  %2989 = vmatpush3.bf16.msra.mxu1 %v3579_v30 }
 0x362   : > { %2966 = vmatprep.subr.bf16.mxu0 %v3543_v17  ;;  %2990 = vmatprep.subr.bf16.mxu1 %v3328_v41 }
 0x365   : > { %2968 = vmatpush1.bf16.msra.mxu0 %v3560_v25  ;;  %2992 = vmatpush3.bf16.msra.mxu1 %v3589_v33 }
 0x366   : > { %2994 = vmatprep.subr.bf16.mxu0 %v3408_v10  ;;  %3025 = vmatprep.subr.bf16.mxu1 %v3328_v41 }
 0x41b   : > { %v1297_v52 = vpop.f32.mrb[6].mxu0  ;;  %v1368_v21 = vpop.f32.mrb[14].mxu1 }
 0x41c   : > { %v3167_v23 = vadd.f32 %v1297_v52, %v3645_v3  ;;  %v1299_v27 = vpop.f32.mrb[7].mxu0  ;;  %v2564_v31 = vpop.f32.mrb[15].mxu1  ;;  %v1386_v43 = vadd.f32 %v3655_v28, %v1368_v21 }
 0x41d   : > { %v3168_v36 = vadd.f32 %v1299_v27, %v3648_v12 }
 0x41e   : > { %v2245_v32 = vmul.f32 -1.442695, %v3167_v23 }
 0x41f   : > { %v2246_v37 = vmul.f32 -1.442695, %v3168_v36 }
 0x420   : > { %3253 = vpow2.f32 %v2245_v32 }
 0x421   : > { %3255 = vpow2.f32 %v2246_v37 }
 0x42a   : > { %v3254_v38 = vpop.eup %3253 }
 0x42b   : > { %v1376_v44 = vadd.f32 1.0, %v3254_v38  ;;  %v3256_v39 = vpop.eup %3255 }
 0x42c   : > { %v1383_v57 = vadd.f32 1.0, %v3256_v39 }
 0x42d   : > { %3257 = vrcp.f32 %v1376_v44 }
 0x437   : > { %v3258_v48 = vpop.eup %3257 }
 0x438   : > { %v1387_v50 = vmul.f32 %v3258_v48, %v1386_v43 }
 0x43a   : > { %v1388_v53 = vadd.f32 %v1387_v50, %v3633_v49 }
 0x43c   : > { %3259 = vtanh.f32 %v1388_v53 }
 0x43d   : > { %3261 = vrcp.f32 %v1383_v57 }
 0x446   : > { %v3260_v59 = vpop.eup %3259 }
 0x447   : > { %v1390_v29 = vsub.f32 %v3757_v19, %v3260_v59  ;;  %v3262_v42 = vpop.eup %3261 }
 0x449   : > { %v1391_v47 = vmul.f32 %v3262_v42, %v1390_v29 }
 0x44b   : > { %v3803_v62 = vadd.f32 %v3260_v59, %v1391_v47 }
 0x44d   : > { %2247 = vst [vmem:[%s3663_s19 + $0x18] sm:$0xff] %v3803_v62  ;;  %1464 = vmatmul.mubr.f32.vlgmr.msra.gmra.mrb[8].mxu0 %v3803_v62  ;;  %2598 = vmatmul.mubr.f32.vlgmr.msra.gmra.mrb[16].mxu1 %v3803_v62 }
 0x44e   : > { %2996 = vmatpush1.bf16.msra.mxu0 %v3414_v15  ;;  %3027 = vmatpush3.bf16.msra.mxu1 %v3457_v40 }
 0x44f   : > { %2998 = vmatprep.subr.bf16.mxu0 %v3417_v16  ;;  %3028 = vmatprep.subr.bf16.mxu1 %v3328_v41 }
 0x450   : > { %1631 = vmatprep.mubr.f32.mxu0 %v3327_v1  ;;  %2632 = vmatprep.mubr.msk.f32.mxu1 %vm3329_vm1, %v3327_v1 }
 0x452   : > { %3000 = vmatpush1.bf16.msra.mxu0 %v3429_v22  ;;  %3030 = vmatpush3.bf16.msra.mxu1 %v3479_v51 }
 0x453   : > { %3002 = vmatprep.subr.bf16.mxu0 %v3433_v24  ;;  %3031 = vmatprep.subr.bf16.mxu1 %v3328_v41 }
 0x456   : > { %3004 = vmatpush1.bf16.msra.mxu0 %v3448_v34  ;;  %3033 = vmatpush3.bf16.msra.mxu1 %v3502_v61 }
 0x457   : > { %3006 = vmatprep.subr.bf16.mxu0 %v3451_v35  ;;  %3034 = vmatprep.subr.bf16.mxu1 %v3328_v41 }
 0x45a   : > { %3008 = vmatpush1.bf16.msra.mxu0 %v3468_v45  ;;  %3036 = vmatpush3.bf16.msra.mxu1 %v3528_v9 }
 0x45b   : > { %3010 = vmatprep.subr.bf16.mxu0 %v3471_v46  ;;  %3037 = vmatprep.subr.bf16.mxu1 %v3328_v41 }
 0x45e   : > { %3012 = vmatpush1.bf16.msra.mxu0 %v3491_v55  ;;  %3039 = vmatpush3.bf16.msra.mxu1 %v3550_v20 }
 0x45f   : > { %3014 = vmatprep.subr.bf16.mxu0 %v3494_v56  ;;  %3040 = vmatprep.subr.bf16.mxu1 %v3328_v41 }
 0x462   : > { %3016 = vmatpush1.bf16.msra.mxu0 %v3514_v2  ;;  %3042 = vmatpush3.bf16.msra.mxu1 %v3567_v26 }
 0x463   : > { %3018 = vmatprep.subr.bf16.mxu0 %v3520_v4  ;;  %3043 = vmatprep.subr.bf16.mxu1 %v3328_v41 }
 0x466   : > { %3020 = vmatpush1.bf16.msra.mxu0 %v3537_v13  ;;  %3045 = vmatpush3.bf16.msra.mxu1 %v3579_v30 }
 0x467   : > { %3022 = vmatprep.subr.bf16.mxu0 %v3543_v17  ;;  %3046 = vmatprep.subr.bf16.mxu1 %v3328_v41 }
 0x46a   : > { %3024 = vmatpush1.bf16.msra.mxu0 %v3560_v25  ;;  %3048 = vmatpush3.bf16.msra.mxu1 %v3589_v33 }
 0x46b   : > { %3050 = vmatprep.subr.bf16.mxu0 %v3408_v10  ;;  %3081 = vmatprep.subr.bf16.mxu1 %v3328_v41 }
 0x520   : > { %v1465_v49 = vpop.f32.mrb[8].mxu0  ;;  %v1536_v0 = vpop.f32.mrb[16].mxu1 }
 0x521   : > { %v3169_v5 = vadd.f32 %v1465_v49, %v3645_v3  ;;  %v1467_v6 = vpop.f32.mrb[9].mxu0  ;;  %v2599_v7 = vpop.f32.mrb[17].mxu1  ;;  %v1554_v21 = vadd.f32 %v3655_v28, %v1536_v0 }
 0x522   : > { %v3170_v11 = vadd.f32 %v1467_v6, %v3648_v12 }
 0x523   : > { %v2248_v8 = vmul.f32 -1.442695, %v3169_v5 }
 0x524   : > { %v2249_v14 = vmul.f32 -1.442695, %v3170_v11 }
 0x525   : > { %3263 = vpow2.f32 %v2248_v8 }
 0x526   : > { %3265 = vpow2.f32 %v2249_v14 }
 0x52f   : > { %v3264_v18 = vpop.eup %3263 }
 0x530   : > { %v1544_v19 = vadd.f32 1.0, %v3264_v18  ;;  %v3266_v52 = vpop.eup %3265 }
 0x531   : > { %v1551_v32 = vadd.f32 1.0, %v3266_v52 }
 0x532   : > { %3267 = vrcp.f32 %v1544_v19 }
 0x53c   : > { %v3268_v23 = vpop.eup %3267 }
 0x53d   : > { %v1555_v27 = vmul.f32 %v3268_v23, %v1554_v21 }
 0x53f   : > { %v1556_v31 = vadd.f32 %v1555_v27, %v3639_v58 }
 0x541   : > { %3269 = vtanh.f32 %v1556_v31 }
 0x542   : > { %3271 = vrcp.f32 %v1551_v32 }
 0x54b   : > { %v3270_v36 = vpop.eup %3269 }
 0x54c   : > { %v1558_v37 = vsub.f32 %v3803_v62, %v3270_v36  ;;  %v3272_v38 = vpop.eup %3271 }
 0x54e   : > { %v1559_v44 = vmul.f32 %v3272_v38, %v1558_v37 }
 0x550   : > { %v3849_v39 = vadd.f32 %v3270_v36, %v1559_v44 }
 0x552   : > { %2250 = vst [vmem:[%s3663_s19 + $0x20] sm:$0xff] %v3849_v39  ;;  %1632 = vmatmul.mubr.f32.vlgmr.msra.gmra.mrb[10].mxu0 %v3849_v39  ;;  %2633 = vmatmul.mubr.f32.vlgmr.msra.gmra.mrb[18].mxu1 %v3849_v39 }
 0x553   : > { %3052 = vmatpush1.bf16.msra.mxu0 %v3414_v15  ;;  %3083 = vmatpush3.bf16.msra.mxu1 %v3457_v40 }
 0x554   : > { %3054 = vmatprep.subr.bf16.mxu0 %v3417_v16  ;;  %3084 = vmatprep.subr.bf16.mxu1 %v3328_v41 }
 0x555   : > { %1799 = vmatprep.mubr.f32.mxu0 %v3327_v1  ;;  %2667 = vmatprep.mubr.msk.f32.mxu1 %vm3329_vm1, %v3327_v1 }
 0x557   : > { %3056 = vmatpush1.bf16.msra.mxu0 %v3429_v22  ;;  %3086 = vmatpush3.bf16.msra.mxu1 %v3479_v51 }
 0x558   : > { %3058 = vmatprep.subr.bf16.mxu0 %v3433_v24  ;;  %3087 = vmatprep.subr.bf16.mxu1 %v3328_v41 }
 0x55b   : > { %3060 = vmatpush1.bf16.msra.mxu0 %v3448_v34  ;;  %3089 = vmatpush3.bf16.msra.mxu1 %v3502_v61 }
 0x55c   : > { %3062 = vmatprep.subr.bf16.mxu0 %v3451_v35  ;;  %3090 = vmatprep.subr.bf16.mxu1 %v3328_v41 }
 0x55f   : > { %3064 = vmatpush1.bf16.msra.mxu0 %v3468_v45  ;;  %3092 = vmatpush3.bf16.msra.mxu1 %v3528_v9 }
 0x560   : > { %3066 = vmatprep.subr.bf16.mxu0 %v3471_v46  ;;  %3093 = vmatprep.subr.bf16.mxu1 %v3328_v41 }
 0x563   : > { %3068 = vmatpush1.bf16.msra.mxu0 %v3491_v55  ;;  %3095 = vmatpush3.bf16.msra.mxu1 %v3550_v20 }
 0x564   : > { %3070 = vmatprep.subr.bf16.mxu0 %v3494_v56  ;;  %3096 = vmatprep.subr.bf16.mxu1 %v3328_v41 }
 0x567   : > { %3072 = vmatpush1.bf16.msra.mxu0 %v3514_v2  ;;  %3098 = vmatpush3.bf16.msra.mxu1 %v3567_v26 }
 0x568   : > { %3074 = vmatprep.subr.bf16.mxu0 %v3520_v4  ;;  %3099 = vmatprep.subr.bf16.mxu1 %v3328_v41 }
 0x56b   : > { %3076 = vmatpush1.bf16.msra.mxu0 %v3537_v13  ;;  %3101 = vmatpush3.bf16.msra.mxu1 %v3579_v30 }
 0x56c   : > { %3078 = vmatprep.subr.bf16.mxu0 %v3543_v17  ;;  %3102 = vmatprep.subr.bf16.mxu1 %v3328_v41 }
 0x56f   : > { %3080 = vmatpush1.bf16.msra.mxu0 %v3560_v25  ;;  %3104 = vmatpush3.bf16.msra.mxu1 %v3589_v33 }
 0x570   : > { %3106 = vmatprep.subr.bf16.mxu0 %v3408_v10  ;;  %3137 = vmatprep.subr.bf16.mxu1 %v3328_v41 }
 0x625   : > { %v1633_v58 = vpop.f32.mrb[10].mxu0  ;;  %v1704_v43 = vpop.f32.mrb[18].mxu1 }
 0x626   : > { %v3171_v48 = vadd.f32 %v1633_v58, %v3645_v3  ;;  %v1635_v50 = vpop.f32.mrb[11].mxu0  ;;  %v2634_v53 = vpop.f32.mrb[19].mxu1  ;;  %v1722_v10 = vadd.f32 %v3655_v28, %v1704_v43 }
 0x627   : > { %v3172_v59 = vadd.f32 %v1635_v50, %v3648_v12 }
 0x628   : > { %v2251_v57 = vmul.f32 -1.442695, %v3171_v48 }
 0x629   : > { %v2252_v29 = vmul.f32 -1.442695, %v3172_v59 }
 0x62a   : > { %3273 = vpow2.f32 %v2251_v57 }
 0x62b   : > { %3275 = vpow2.f32 %v2252_v29 }
 0x634   : > { %v3274_v42 = vpop.eup %3273 }
 0x635   : > { %v1712_v47 = vadd.f32 1.0, %v3274_v42  ;;  %v3276_v62 = vpop.eup %3275 }
 0x636   : > { %v1719_v6 = vadd.f32 1.0, %v3276_v62 }
 0x637   : > { %3277 = vrcp.f32 %v1712_v47 }
 0x641   : > { %v3278_v49 = vpop.eup %3277 }
 0x642   : > { %v1723_v0 = vmul.f32 %v3278_v49, %v1722_v10 }
 0x644   : > { %v1724_v5 = vadd.f32 %v1723_v0, %v3637_v54 }
 0x646   : > { %3279 = vtanh.f32 %v1724_v5 }
 0x647   : > { %3281 = vrcp.f32 %v1719_v6 }
 0x650   : > { %v3280_v7 = vpop.eup %3279 }
 0x651   : > { %v1726_v8 = vsub.f32 %v3849_v39, %v3280_v7  ;;  %v3282_v11 = vpop.eup %3281 }
 0x653   : > { %v1727_v14 = vmul.f32 %v3282_v11, %v1726_v8 }
 0x655   : > { %v1728_v18 = vadd.f32 %v3280_v7, %v1727_v14 }
 0x657   : > { %2253 = vst [vmem:[%s3663_s19 + $0x28] sm:$0xff] %v1728_v18  ;;  %1800 = vmatmul.mubr.f32.vlgmr.msra.gmra.mrb[12].mxu0 %v1728_v18  ;;  %2668 = vmatmul.mubr.f32.vlgmr.msra.gmra.mrb[20].mxu1 %v1728_v18 }
 0x658   : > { %3108 = vmatpush1.bf16.msra.mxu0 %v3414_v15  ;;  %3139 = vmatpush3.bf16.msra.mxu1 %v3457_v40 }
 0x659   : > { %3110 = vmatprep.subr.bf16.mxu0 %v3417_v16  ;;  %3140 = vmatprep.subr.bf16.mxu1 %v3328_v41 }
 0x65a   : > { %1967 = vmatprep.mubr.f32.mxu0 %v3327_v1  ;;  %2702 = vmatprep.mubr.msk.f32.mxu1 %vm3329_vm1, %v3327_v1 }
 0x65c   : > { %3112 = vmatpush1.bf16.msra.mxu0 %v3429_v22  ;;  %3142 = vmatpush3.bf16.msra.mxu1 %v3479_v51 }
 0x65d   : > { %3114 = vmatprep.subr.bf16.mxu0 %v3433_v24  ;;  %3143 = vmatprep.subr.bf16.mxu1 %v3328_v41 }
 0x660   : > { %3116 = vmatpush1.bf16.msra.mxu0 %v3448_v34  ;;  %3145 = vmatpush3.bf16.msra.mxu1 %v3502_v61 }
 0x661   : > { %3118 = vmatprep.subr.bf16.mxu0 %v3451_v35  ;;  %3146 = vmatprep.subr.bf16.mxu1 %v3328_v41 }
 0x664   : > { %3120 = vmatpush1.bf16.msra.mxu0 %v3468_v45  ;;  %3148 = vmatpush3.bf16.msra.mxu1 %v3528_v9 }
 0x665   : > { %3122 = vmatprep.subr.bf16.mxu0 %v3471_v46  ;;  %3149 = vmatprep.subr.bf16.mxu1 %v3328_v41 }
 0x668   : > { %3124 = vmatpush1.bf16.msra.mxu0 %v3491_v55  ;;  %3151 = vmatpush3.bf16.msra.mxu1 %v3550_v20 }
 0x669   : > { %3126 = vmatprep.subr.bf16.mxu0 %v3494_v56  ;;  %3152 = vmatprep.subr.bf16.mxu1 %v3328_v41 }
 0x66c   : > { %3128 = vmatpush1.bf16.msra.mxu0 %v3514_v2  ;;  %3154 = vmatpush3.bf16.msra.mxu1 %v3567_v26 }
 0x66d   : > { %3130 = vmatprep.subr.bf16.mxu0 %v3520_v4  ;;  %3155 = vmatprep.subr.bf16.mxu1 %v3328_v41 }
 0x670   : > { %3132 = vmatpush1.bf16.msra.mxu0 %v3537_v13  ;;  %3157 = vmatpush3.bf16.msra.mxu1 %v3579_v30 }
 0x671   : > { %3134 = vmatprep.subr.bf16.mxu0 %v3543_v17  ;;  %3158 = vmatprep.subr.bf16.mxu1 %v3328_v41 }
 0x674   : > { %3136 = vmatpush1.bf16.msra.mxu0 %v3560_v25  ;;  %3160 = vmatpush3.bf16.msra.mxu1 %v3589_v33 }
 0x72a   : > { %v1801_v1 = vpop.f32.mrb[12].mxu0  ;;  %v1872_v15 = vpop.f32.mrb[20].mxu1 }
 0x72b   : > { %v3173_v16 = vadd.f32 %v1801_v1, %v3645_v3  ;;  %v1803_v22 = vpop.f32.mrb[13].mxu0  ;;  %v2669_v24 = vpop.f32.mrb[21].mxu1  ;;  %v1890_v51 = vadd.f32 %v3655_v28, %v1872_v15 }
 0x72c   : > { %v3174_v35 = vadd.f32 %v1803_v22, %v3648_v12 }
 0x72d   : > { %v2254_v34 = vmul.f32 -1.442695, %v3173_v16 }
 0x72e   : > { %v2255_v40 = vmul.f32 -1.442695, %v3174_v35 }
 0x72f   : > { %3283 = vpow2.f32 %v2254_v34 }
 0x730   : > { %3285 = vpow2.f32 %v2255_v40 }
 0x739   : > { %v3284_v45 = vpop.eup %3283 }
 0x73a   : > { %v1880_v46 = vadd.f32 1.0, %v3284_v45  ;;  %v3286_v41 = vpop.eup %3285 }
 0x73b   : > { %v1887_v2 = vadd.f32 1.0, %v3286_v41 }
 0x73c   : > { %3287 = vrcp.f32 %v1880_v46 }
 0x746   : > { %v3288_v55 = vpop.eup %3287 }
 0x747   : > { %v1891_v56 = vmul.f32 %v3288_v55, %v1890_v51 }
 0x749   : > { %v1892_v61 = vadd.f32 %v1891_v56, %v3643_v63 }
 0x74b   : > { %3289 = vtanh.f32 %v1892_v61 }
 0x74c   : > { %3291 = vrcp.f32 %v1887_v2 }
 0x755   : > { %v3290_v4 = vpop.eup %3289 }
 0x756   : > { %v1894_v9 = vsub.f32 %v1728_v18, %v3290_v4  ;;  %v3292_v13 = vpop.eup %3291 }
 0x758   : > { %v1895_v17 = vmul.f32 %v3292_v13, %v1894_v9 }
 0x75a   : > { %v1896_v20 = vadd.f32 %v3290_v4, %v1895_v17 }
 0x75c   : > { %2256 = vst [vmem:[%s3663_s19 + $0x30] sm:$0xff] %v1896_v20  ;;  %1968 = vmatmul.mubr.f32.vlgmr.msra.gmra.mrb[14].mxu0 %v1896_v20  ;;  %2703 = vmatmul.mubr.f32.vlgmr.msra.gmra.mrb[22].mxu1 %v1896_v20 }
 0x82f   : > { %v1969_v25 = vpop.f32.mrb[14].mxu0  ;;  %v2040_v26 = vpop.f32.mrb[22].mxu1 }
 0x830   : > { %v3175_v30 = vadd.f32 %v1969_v25, %v3645_v3  ;;  %v1971_v33 = vpop.f32.mrb[15].mxu0  ;;  %v2704_v54 = vpop.f32.mrb[23].mxu1  ;;  %v2058_v31 = vadd.f32 %v3655_v28, %v2040_v26 }
 0x831   : > { %v3176_v63 = vadd.f32 %v1971_v33, %v3648_v12 }
 0x832   : > { %v2257_v19 = vmul.f32 -1.442695, %v3175_v30 }
 0x833   : > { %v2258_v52 = vmul.f32 -1.442695, %v3176_v63 }
 0x834   : > { %3293 = vpow2.f32 %v2257_v19 }
 0x835   : > { %3295 = vpow2.f32 %v2258_v52 }
 0x83e   : > { %v3294_v21 = vpop.eup %3293 }
 0x83f   : > { %v2048_v23 = vadd.f32 1.0, %v3294_v21  ;;  %v3296_v27 = vpop.eup %3295 }
 0x840   : > { %v2055_v3 = vadd.f32 1.0, %v3296_v27 }
 0x841   : > { %3297 = vrcp.f32 %v2048_v23 }
 0x84b   : > { %v3298_v32 = vpop.eup %3297 }
 0x84c   : > { %v2059_v36 = vmul.f32 %v3298_v32, %v2058_v31 }
 0x84e   : > { %v2060_v37 = vadd.f32 %v2059_v36, %v3641_v60 }
 0x850   : > { %3299 = vtanh.f32 %v2060_v37 }
 0x851   : > { %3301 = vrcp.f32 %v2055_v3 }
 0x85a   : > { %v3300_v38 = vpop.eup %3299 }
 0x85b   : > { %v2062_v44 = vsub.f32 %v1896_v20, %v3300_v38  ;;  %v3302_v39 = vpop.eup %3301 }
 0x85d   : > { %v2063_v12 = vmul.f32 %v3302_v39, %v2062_v44 }
 0x85f   : > { %v2064_v58 = vadd.f32 %v3300_v38, %v2063_v12 }
 0x861   : > { %2259 = vst [vmem:[%s3663_s19 + $0x38] sm:$0xff] %v2064_v58 }
 0x862 PF: > { %s16_s23 = sadd.s32 1, %s3325_s23   ;;  %s3955_s21 = smov %s3321_s22 }
 0x863   : > { %p13_p5 = scmp.ge.s32.totalorder %s16_s23, 4   ;;  %s3956_s22 = smov %s3958_s24 }
 0x865   :  { %15 = sbr.rel (!%p13_p5) target bundleno = 2 (0x2), region = 107 }

</bundles_post_ra>
